<compile_context>
chip_gen: v5e
topology: v5e:2x2
jax: 0.10.0
libtpu: 0.0.40
codegen_flags: <defaults>
</compile_context>

<pallas_src>
import functools

import numpy as np

import jax
import jax.numpy as jnp
from jax.experimental import pallas as pl
from jax.experimental.pallas import tpu as pltpu

NP = 128  # lane width used for every layer's packed output chunk


# ---------------------------------------------------------------------------
# Fused whole-network Pallas kernel
# ---------------------------------------------------------------------------
def _uji_critic_kernel(x_ref, wt_ref, r1_ref, r2_ref, r3_ref, r4_ref, aff_ref,
                       arow2_ref, acol2_ref, arow3_ref, acol3_ref, o_ref,
                       *, cols, khs, npad, slope, eps):
    f32 = jnp.float32

    def conv(x_in, r_ref, col0, kh):
        # Width-Toeplitz matmul (all tap rows at once, lane-chunked) followed
        # by kh 0/1 row-selection matmuls that gather strided/padded rows and
        # sum the tap-row contributions.  Lane slices are 128-aligned (free).
        z = jnp.dot(x_in, wt_ref[:, col0:col0 + kh * npad],
                    preferred_element_type=f32)
        acc = jnp.dot(r_ref[0], z[:, :npad], preferred_element_type=f32)
        for i in range(1, kh):
            acc = acc + jnp.dot(r_ref[i], z[:, i * npad:(i + 1) * npad],
                                preferred_element_type=f32)
        return acc

    def lrelu(v):
        return jnp.where(v >= 0, v, slope * v)

    def inorm(pre, arow_ref, acol_ref, g_idx, b_idx):
        # Per-(batch, channel) mean/variance, broadcast back to every (oy, ox)
        # position, all via averaging matmuls (no relayouts).
        arow = arow_ref[...]
        acol = acol_ref[...]
        m = jnp.dot(jnp.dot(arow, pre, preferred_element_type=f32), acol,
                    preferred_element_type=f32)
        d = pre - m
        var = jnp.dot(jnp.dot(arow, d * d, preferred_element_type=f32), acol,
                      preferred_element_type=f32)
        y = d * jax.lax.rsqrt(var + eps)
        return y * aff_ref[g_idx] + aff_ref[b_idx]

    x = x_ref[...]                                            # (B*H, W*Cin)
    # Layer 1: Conv(k3,s2,p1) + bias + LeakyReLU
    y = lrelu(conv(x, r1_ref, cols[0], khs[0]) + aff_ref[0])
    # Layer 2: Conv(k4,s2,p1,no bias) + InstanceNorm(affine) + LeakyReLU
    y = lrelu(inorm(conv(y, r2_ref, cols[1], khs[1]),
                    arow2_ref, acol2_ref, 1, 2))
    # Layer 3: Conv(k4,s2,p1,no bias) + InstanceNorm(affine) + LeakyReLU
    y = lrelu(inorm(conv(y, r3_ref, cols[2], khs[2]),
                    arow3_ref, acol3_ref, 3, 4))
    # Layer 4: Conv(k3,s1,p0) + bias
    y = conv(y, r4_ref, cols[3], khs[3]) + aff_ref[5]
    o_ref[...] = y                                            # (B*Ho4, 128)


# ---------------------------------------------------------------------------
# One-time parameter packing (hoisted out of the forward path)
# ---------------------------------------------------------------------------
def pack_params(params, *, batch, height, width):
    """Packs PyTorch-layout parameters into the constant matmul operands used
    by the fused kernel: width-Toeplitz weight slabs, 0/1 row-selection
    matrices, averaging matrices for InstanceNorm, and tiled affine rows."""
    convs = [  # (weight key, bias key or None, stride, pad)
        ("w1", "b1", 2, 1),
        ("w2", None, 2, 1),
        ("w3", None, 2, 1),
        ("w4", "b4", 1, 0),
    ]
    h, w = height, width
    slabs, rsels, outdims = [], [], []
    for wkey, _bkey, s, p in convs:
        wgt = np.asarray(params[wkey], np.float32)
        cout, cin, kh, kw = wgt.shape
        ho = (h + 2 * p - kh) // s + 1
        wo = (w + 2 * p - kw) // s + 1
        assert w * cin <= NP and wo * cout <= NP, (
            "packing assumes <=128 lanes per activation row for this config")
        # Width-Toeplitz slab: rows = input lanes (x, cin), cols = kh chunks of
        # 128 output lanes (ox, cout).  Zero columns handle width padding.
        slab = np.zeros((NP, kh * NP), np.float32)
        for i in range(kh):
            for ox in range(wo):
                for j in range(kw):
                    xx = s * ox + j - p
                    if 0 <= xx < w:
                        slab[xx * cin:(xx + 1) * cin,
                             i * NP + ox * cout: i * NP + ox * cout + cout] \
                            = wgt[:, :, i, j].T
        # Row selection: block-diag over batch; zero rows handle height padding.
        rsel = np.zeros((kh, batch * ho, batch * h), np.float32)
        for i in range(kh):
            for bb in range(batch):
                for oy in range(ho):
                    yy = s * oy + i - p
                    if 0 <= yy < h:
                        rsel[i, bb * ho + oy, bb * h + yy] = 1.0
        slabs.append(slab)
        rsels.append(rsel)
        outdims.append((ho, wo, cout))
        h, w = ho, wo

    wt = np.concatenate(slabs, axis=1)           # (128, sum_l kh_l*128)

    def tile_row(vec, wo):
        row = np.zeros((1, NP), np.float32)
        v = np.asarray(vec, np.float32).reshape(-1)
        row[0, :wo * v.shape[0]] = np.tile(v, wo)
        return row

    (_, wo1, _), (ho2, wo2, c2), (ho3, wo3, c3), (_, wo4, _) = outdims
    aff = np.stack([
        tile_row(params["b1"], wo1),
        tile_row(params["g2"], wo2),
        tile_row(params["be2"], wo2),
        tile_row(params["g3"], wo3),
        tile_row(params["be3"], wo3),
        tile_row(params["b4"], wo4),
    ], axis=0)                                   # (6, 1, 128)

    def row_avg(ho):
        a = np.zeros((batch * ho, batch * ho), np.float32)
        for bb in range(batch):
            a[bb * ho:(bb + 1) * ho, bb * ho:(bb + 1) * ho] = 1.0 / ho
        return a

    def chan_avg(wo, cout):
        a = np.zeros((NP, NP), np.float32)
        n = wo * cout
        for pp in range(n):
            for qq in range(n):
                if pp % cout == qq % cout:
                    a[pp, qq] = 1.0 / wo
        return a

    return {
        "wt": jnp.asarray(wt),
        "r1": jnp.asarray(rsels[0]), "r2": jnp.asarray(rsels[1]),
        "r3": jnp.asarray(rsels[2]), "r4": jnp.asarray(rsels[3]),
        "aff": jnp.asarray(aff),
        "arow2": jnp.asarray(row_avg(ho2)), "acol2": jnp.asarray(chan_avg(wo2, c2)),
        "arow3": jnp.asarray(row_avg(ho3)), "acol3": jnp.asarray(chan_avg(wo3, c3)),
    }


# ---------------------------------------------------------------------------
# Forward pass (NCHW in / NCHW out, one fused pallas_call)
# ---------------------------------------------------------------------------
def uji_discriminator_forward(x_nchw, packed):
    B, C, H, W = x_nchw.shape
    # Single NCHW->NHWC transpose at entry; rows=(b,y), lanes=(x,c).
    x2d = jnp.transpose(x_nchw, (0, 2, 3, 1)).reshape(B * H, W * C)
    if W * C < NP:
        x2d = jnp.pad(x2d, ((0, 0), (0, NP - W * C)))

    kh1 = packed["r1"].shape[0]
    kh2 = packed["r2"].shape[0]
    kh3 = packed["r3"].shape[0]
    kh4 = packed["r4"].shape[0]
    cols = (0, kh1 * NP, (kh1 + kh2) * NP, (kh1 + kh2 + kh3) * NP)
    rows_out = packed["r4"].shape[1]             # B * Ho4

    # Output spatial size from the fixed architecture (static Python ints).
    h1 = (H + 2 - 3) // 2 + 1
    h2 = (h1 + 2 - 4) // 2 + 1
    h3 = (h2 + 2 - 4) // 2 + 1
    ho4 = h3 - 3 + 1
    w1 = (W + 2 - 3) // 2 + 1
    w2 = (w1 + 2 - 4) // 2 + 1
    w3 = (w2 + 2 - 4) // 2 + 1
    wo4 = w3 - 3 + 1

    def fullspec(shape):
        return pl.BlockSpec(shape, lambda i, _n=len(shape): (0,) * _n)

    operands = (x2d, packed["wt"], packed["r1"], packed["r2"], packed["r3"],
                packed["r4"], packed["aff"], packed["arow2"], packed["acol2"],
                packed["arow3"], packed["acol3"])

    out = pl.pallas_call(
        functools.partial(_uji_critic_kernel, cols=cols,
                          khs=(kh1, kh2, kh3, kh4), npad=NP,
                          slope=0.2, eps=1e-5),
        out_shape=jax.ShapeDtypeStruct((rows_out, NP), jnp.float32),
        grid_spec=pltpu.PrefetchScalarGridSpec(
            num_scalar_prefetch=0,
            grid=(1,),
            in_specs=[fullspec(op.shape) for op in operands],
            out_specs=fullspec((rows_out, NP)),
        ),
        compiler_params=pltpu.CompilerParams(
            dimension_semantics=("arbitrary",)),
    )(*operands)

    # Only un-padding in the whole forward: lanes are (ox, co) with Cout=1.
    return out[:, :wo4].reshape(B, ho4, wo4)[:, None, :, :]


# ---------------------------------------------------------------------------
# Pure-JAX reference (for correctness check)
# ---------------------------------------------------------------------------
def _ref_forward(x, p):
    lrelu = lambda v: jnp.where(v >= 0, v, 0.2 * v)

    def conv(v, w, b, stride, pad):
        out = jax.lax.conv_general_dilated(
            v, w, (stride, stride), [(pad, pad), (pad, pad)],
            dimension_numbers=("NCHW", "OIHW", "NCHW"),
            precision=jax.lax.Precision.HIGHEST)
        if b is not None:
            out = out + b.reshape(1, -1, 1, 1)
        return out

    def inorm(v, g, b):
        m = v.mean(axis=(2, 3), keepdims=True)
        var = ((v - m) ** 2).mean(axis=(2, 3), keepdims=True)
        return ((v - m) * jax.lax.rsqrt(var + 1e-5) * g.reshape(1, -1, 1, 1)
                + b.reshape(1, -1, 1, 1))

    r = lrelu(conv(x, p["w1"], p["b1"], 2, 1))
    r = lrelu(inorm(conv(r, p["w2"], None, 2, 1), p["g2"], p["be2"]))
    r = lrelu(inorm(conv(r, p["w3"], None, 2, 1), p["g3"], p["be3"]))
    r = conv(r, p["w4"], p["b4"], 1, 0)
    return r


# ---------------------------------------------------------------------------
if __name__ == "__main__":
    key = jax.random.PRNGKey(0)
    channels_img, features_d = 4, 4
    B, H, W = 2, 32, 32                    # spatial: 32 -> 16 -> 8 -> 4 -> 2
    fd2, fd4, fd8 = features_d * 2, features_d * 4, features_d * 8

    ks = jax.random.split(key, 11)
    params = {
        "w1": jax.random.normal(ks[0], (fd2, channels_img, 3, 3), jnp.float32) * 0.1,
        "b1": jax.random.normal(ks[1], (fd2,), jnp.float32) * 0.1,
        "w2": jax.random.normal(ks[2], (fd4, fd2, 4, 4), jnp.float32) * 0.1,
        "g2": 1.0 + jax.random.normal(ks[3], (fd4,), jnp.float32) * 0.1,
        "be2": jax.random.normal(ks[4], (fd4,), jnp.float32) * 0.1,
        "w3": jax.random.normal(ks[5], (fd8, fd4, 4, 4), jnp.float32) * 0.1,
        "g3": 1.0 + jax.random.normal(ks[6], (fd8,), jnp.float32) * 0.1,
        "be3": jax.random.normal(ks[7], (fd8,), jnp.float32) * 0.1,
        "w4": jax.random.normal(ks[8], (1, fd8, 3, 3), jnp.float32) * 0.1,
        "b4": jax.random.normal(ks[9], (1,), jnp.float32) * 0.1,
    }
    x = jax.random.normal(ks[10], (B, channels_img, H, W), jnp.float32)

    # One-time parameter packing (not in the per-forward path).
    packed = pack_params(params, batch=B, height=H, width=W)

    fwd = jax.jit(uji_discriminator_forward)
    out = jax.block_until_ready(fwd(x, packed))
    ref = jax.block_until_ready(_ref_forward(x, params))

    assert out.shape == (B, 1, 2, 2), out.shape
    max_err = float(jnp.max(jnp.abs(out - ref)))
    assert jnp.allclose(out, ref, atol=1e-4, rtol=1e-4), max_err
    print("KERNEL_OK")
</pallas_src>

<mosaic_0001>
module attributes {stable_mosaic.version = 11 : i64} {
  func.func @_uji_critic_kernel(%arg0: i32, %arg1: memref<64x128xf32, #tpu.memory_space<vmem>>, %arg2: memref<128x1792xf32, #tpu.memory_space<vmem>>, %arg3: memref<3x32x64xf32, #tpu.memory_space<vmem>>, %arg4: memref<4x16x32xf32, #tpu.memory_space<vmem>>, %arg5: memref<4x8x16xf32, #tpu.memory_space<vmem>>, %arg6: memref<3x4x8xf32, #tpu.memory_space<vmem>>, %arg7: memref<6x1x128xf32, #tpu.memory_space<vmem>>, %arg8: memref<16x16xf32, #tpu.memory_space<vmem>>, %arg9: memref<128x128xf32, #tpu.memory_space<vmem>>, %arg10: memref<8x8xf32, #tpu.memory_space<vmem>>, %arg11: memref<128x128xf32, #tpu.memory_space<vmem>>, %arg12: memref<4x128xf32, #tpu.memory_space<vmem>>) attributes {dimension_semantics = [#tpu.dimension_semantics<arbitrary>], iteration_bounds = array<i64: 1>, scalar_prefetch = 0 : i64, scratch_operands = 0 : i64, tpu.core_type = #tpu.core_type<tc>, window_params = [{pipeline_mode = #tpu.pipeline_mode<synchronous>, transform_indices = @transform_0, window_bounds = array<i64: 64, 128>}, {pipeline_mode = #tpu.pipeline_mode<synchronous>, transform_indices = @transform_1, window_bounds = array<i64: 128, 1792>}, {pipeline_mode = #tpu.pipeline_mode<synchronous>, transform_indices = @transform_2, window_bounds = array<i64: 3, 32, 64>}, {pipeline_mode = #tpu.pipeline_mode<synchronous>, transform_indices = @transform_3, window_bounds = array<i64: 4, 16, 32>}, {pipeline_mode = #tpu.pipeline_mode<synchronous>, transform_indices = @transform_4, window_bounds = array<i64: 4, 8, 16>}, {pipeline_mode = #tpu.pipeline_mode<synchronous>, transform_indices = @transform_5, window_bounds = array<i64: 3, 4, 8>}, {pipeline_mode = #tpu.pipeline_mode<synchronous>, transform_indices = @transform_6, window_bounds = array<i64: 6, 1, 128>}, {pipeline_mode = #tpu.pipeline_mode<synchronous>, transform_indices = @transform_7, window_bounds = array<i64: 16, 16>}, {pipeline_mode = #tpu.pipeline_mode<synchronous>, transform_indices = @transform_8, window_bounds = array<i64: 128, 128>}, {pipeline_mode = #tpu.pipeline_mode<synchronous>, transform_indices = @transform_9, window_bounds = array<i64: 8, 8>}, {pipeline_mode = #tpu.pipeline_mode<synchronous>, transform_indices = @transform_10, window_bounds = array<i64: 128, 128>}, {pipeline_mode = #tpu.pipeline_mode<synchronous>, transform_indices = @transform_11, window_bounds = array<i64: 4, 128>}]} {
    %c0 = arith.constant 0 : index
    %c0_0 = arith.constant 0 : index
    %0 = vector.load %arg1[%c0, %c0_0] : memref<64x128xf32, #tpu.memory_space<vmem>>, vector<64x128xf32>
    %c0_1 = arith.constant 0 : index
    %c0_2 = arith.constant 0 : index
    %1 = vector.load %arg2[%c0_1, %c0_2] : memref<128x1792xf32, #tpu.memory_space<vmem>>, vector<128x384xf32>
    %cst = arith.constant dense<0.000000e+00> : vector<64x384xf32>
    %2 = tpu.matmul %0, %1, %cst {dimension_numbers = #tpu.dot_dimension_numbers<[1], [0], [0], [1], [0, 0, 1, 1], [], []>} : vector<64x128xf32>, vector<128x384xf32>, vector<64x384xf32> -> vector<64x384xf32>
    %c0_3 = arith.constant 0 : index
    %c0_4 = arith.constant 0 : index
    %c0_5 = arith.constant 0 : index
    %3 = vector.load %arg3[%c0_3, %c0_4, %c0_5] : memref<3x32x64xf32, #tpu.memory_space<vmem>>, vector<1x32x64xf32>
    %4 = vector.shape_cast %3 : vector<1x32x64xf32> to vector<32x64xf32>
    %5 = vector.extract_strided_slice %2 {offsets = [0, 0], sizes = [64, 128], strides = [1, 1]} : vector<64x384xf32> to vector<64x128xf32>
    %cst_6 = arith.constant dense<0.000000e+00> : vector<32x128xf32>
    %6 = tpu.matmul %4, %5, %cst_6 {dimension_numbers = #tpu.dot_dimension_numbers<[1], [0], [0], [1], [0, 0, 1, 1], [], []>} : vector<32x64xf32>, vector<64x128xf32>, vector<32x128xf32> -> vector<32x128xf32>
    %c1 = arith.constant 1 : index
    %c0_7 = arith.constant 0 : index
    %c0_8 = arith.constant 0 : index
    %7 = vector.load %arg3[%c1, %c0_7, %c0_8] : memref<3x32x64xf32, #tpu.memory_space<vmem>>, vector<1x32x64xf32>
    %8 = vector.shape_cast %7 : vector<1x32x64xf32> to vector<32x64xf32>
    %9 = vector.extract_strided_slice %2 {offsets = [0, 128], sizes = [64, 128], strides = [1, 1]} : vector<64x384xf32> to vector<64x128xf32>
    %cst_9 = arith.constant dense<0.000000e+00> : vector<32x128xf32>
    %10 = tpu.matmul %8, %9, %cst_9 {dimension_numbers = #tpu.dot_dimension_numbers<[1], [0], [0], [1], [0, 0, 1, 1], [], []>} : vector<32x64xf32>, vector<64x128xf32>, vector<32x128xf32> -> vector<32x128xf32>
    %11 = arith.addf %6, %10 : vector<32x128xf32>
    %c2 = arith.constant 2 : index
    %c0_10 = arith.constant 0 : index
    %c0_11 = arith.constant 0 : index
    %12 = vector.load %arg3[%c2, %c0_10, %c0_11] : memref<3x32x64xf32, #tpu.memory_space<vmem>>, vector<1x32x64xf32>
    %13 = vector.shape_cast %12 : vector<1x32x64xf32> to vector<32x64xf32>
    %14 = vector.extract_strided_slice %2 {offsets = [0, 256], sizes = [64, 128], strides = [1, 1]} : vector<64x384xf32> to vector<64x128xf32>
    %cst_12 = arith.constant dense<0.000000e+00> : vector<32x128xf32>
    %15 = tpu.matmul %13, %14, %cst_12 {dimension_numbers = #tpu.dot_dimension_numbers<[1], [0], [0], [1], [0, 0, 1, 1], [], []>} : vector<32x64xf32>, vector<64x128xf32>, vector<32x128xf32> -> vector<32x128xf32>
    %16 = arith.addf %11, %15 : vector<32x128xf32>
    %c0_13 = arith.constant 0 : index
    %c0_14 = arith.constant 0 : index
    %c0_15 = arith.constant 0 : index
    %17 = vector.load %arg7[%c0_13, %c0_14, %c0_15] : memref<6x1x128xf32, #tpu.memory_space<vmem>>, vector<1x1x128xf32>
    %18 = vector.shape_cast %17 : vector<1x1x128xf32> to vector<1x128xf32>
    %19 = vector.broadcast %18 : vector<1x128xf32> to vector<32x128xf32>
    %20 = arith.addf %16, %19 : vector<32x128xf32>
    %cst_16 = arith.constant 0.000000e+00 : f32
    %21 = vector.broadcast %cst_16 : f32 to vector<32x128xf32>
    %22 = arith.cmpf oge, %20, %21 : vector<32x128xf32>
    %cst_17 = arith.constant 2.000000e-01 : f32
    %23 = vector.broadcast %cst_17 : f32 to vector<32x128xf32>
    %24 = arith.mulf %23, %20 : vector<32x128xf32>
    %25 = arith.select %22, %20, %24 : vector<32x128xi1>, vector<32x128xf32>
    %c0_18 = arith.constant 0 : index
    %c384 = arith.constant 384 : index
    %26 = vector.load %arg2[%c0_18, %c384] : memref<128x1792xf32, #tpu.memory_space<vmem>>, vector<128x512xf32>
    %cst_19 = arith.constant dense<0.000000e+00> : vector<32x512xf32>
    %27 = tpu.matmul %25, %26, %cst_19 {dimension_numbers = #tpu.dot_dimension_numbers<[1], [0], [0], [1], [0, 0, 1, 1], [], []>} : vector<32x128xf32>, vector<128x512xf32>, vector<32x512xf32> -> vector<32x512xf32>
    %c0_20 = arith.constant 0 : index
    %c0_21 = arith.constant 0 : index
    %c0_22 = arith.constant 0 : index
    %28 = vector.load %arg4[%c0_20, %c0_21, %c0_22] : memref<4x16x32xf32, #tpu.memory_space<vmem>>, vector<1x16x32xf32>
    %29 = vector.shape_cast %28 : vector<1x16x32xf32> to vector<16x32xf32>
    %30 = vector.extract_strided_slice %27 {offsets = [0, 0], sizes = [32, 128], strides = [1, 1]} : vector<32x512xf32> to vector<32x128xf32>
    %cst_23 = arith.constant dense<0.000000e+00> : vector<16x128xf32>
    %31 = tpu.matmul %29, %30, %cst_23 {dimension_numbers = #tpu.dot_dimension_numbers<[1], [0], [0], [1], [0, 0, 1, 1], [], []>} : vector<16x32xf32>, vector<32x128xf32>, vector<16x128xf32> -> vector<16x128xf32>
    %c1_24 = arith.constant 1 : index
    %c0_25 = arith.constant 0 : index
    %c0_26 = arith.constant 0 : index
    %32 = vector.load %arg4[%c1_24, %c0_25, %c0_26] : memref<4x16x32xf32, #tpu.memory_space<vmem>>, vector<1x16x32xf32>
    %33 = vector.shape_cast %32 : vector<1x16x32xf32> to vector<16x32xf32>
    %34 = vector.extract_strided_slice %27 {offsets = [0, 128], sizes = [32, 128], strides = [1, 1]} : vector<32x512xf32> to vector<32x128xf32>
    %cst_27 = arith.constant dense<0.000000e+00> : vector<16x128xf32>
    %35 = tpu.matmul %33, %34, %cst_27 {dimension_numbers = #tpu.dot_dimension_numbers<[1], [0], [0], [1], [0, 0, 1, 1], [], []>} : vector<16x32xf32>, vector<32x128xf32>, vector<16x128xf32> -> vector<16x128xf32>
    %36 = arith.addf %31, %35 : vector<16x128xf32>
    %c2_28 = arith.constant 2 : index
    %c0_29 = arith.constant 0 : index
    %c0_30 = arith.constant 0 : index
    %37 = vector.load %arg4[%c2_28, %c0_29, %c0_30] : memref<4x16x32xf32, #tpu.memory_space<vmem>>, vector<1x16x32xf32>
    %38 = vector.shape_cast %37 : vector<1x16x32xf32> to vector<16x32xf32>
    %39 = vector.extract_strided_slice %27 {offsets = [0, 256], sizes = [32, 128], strides = [1, 1]} : vector<32x512xf32> to vector<32x128xf32>
    %cst_31 = arith.constant dense<0.000000e+00> : vector<16x128xf32>
    %40 = tpu.matmul %38, %39, %cst_31 {dimension_numbers = #tpu.dot_dimension_numbers<[1], [0], [0], [1], [0, 0, 1, 1], [], []>} : vector<16x32xf32>, vector<32x128xf32>, vector<16x128xf32> -> vector<16x128xf32>
    %41 = arith.addf %36, %40 : vector<16x128xf32>
    %c3 = arith.constant 3 : index
    %c0_32 = arith.constant 0 : index
    %c0_33 = arith.constant 0 : index
    %42 = vector.load %arg4[%c3, %c0_32, %c0_33] : memref<4x16x32xf32, #tpu.memory_space<vmem>>, vector<1x16x32xf32>
    %43 = vector.shape_cast %42 : vector<1x16x32xf32> to vector<16x32xf32>
    %44 = vector.extract_strided_slice %27 {offsets = [0, 384], sizes = [32, 128], strides = [1, 1]} : vector<32x512xf32> to vector<32x128xf32>
    %cst_34 = arith.constant dense<0.000000e+00> : vector<16x128xf32>
    %45 = tpu.matmul %43, %44, %cst_34 {dimension_numbers = #tpu.dot_dimension_numbers<[1], [0], [0], [1], [0, 0, 1, 1], [], []>} : vector<16x32xf32>, vector<32x128xf32>, vector<16x128xf32> -> vector<16x128xf32>
    %46 = arith.addf %41, %45 : vector<16x128xf32>
    %c0_35 = arith.constant 0 : index
    %c0_36 = arith.constant 0 : index
    %47 = vector.load %arg8[%c0_35, %c0_36] : memref<16x16xf32, #tpu.memory_space<vmem>>, vector<16x16xf32>
    %c0_37 = arith.constant 0 : index
    %c0_38 = arith.constant 0 : index
    %48 = vector.load %arg9[%c0_37, %c0_38] : memref<128x128xf32, #tpu.memory_space<vmem>>, vector<128x128xf32>
    %cst_39 = arith.constant dense<0.000000e+00> : vector<16x128xf32>
    %49 = tpu.matmul %47, %46, %cst_39 {dimension_numbers = #tpu.dot_dimension_numbers<[1], [0], [0], [1], [0, 0, 1, 1], [], []>} : vector<16x16xf32>, vector<16x128xf32>, vector<16x128xf32> -> vector<16x128xf32>
    %cst_40 = arith.constant dense<0.000000e+00> : vector<16x128xf32>
    %50 = tpu.matmul %49, %48, %cst_40 {dimension_numbers = #tpu.dot_dimension_numbers<[1], [0], [0], [1], [0, 0, 1, 1], [], []>} : vector<16x128xf32>, vector<128x128xf32>, vector<16x128xf32> -> vector<16x128xf32>
    %51 = arith.subf %46, %50 : vector<16x128xf32>
    %52 = arith.mulf %51, %51 : vector<16x128xf32>
    %cst_41 = arith.constant dense<0.000000e+00> : vector<16x128xf32>
    %53 = tpu.matmul %47, %52, %cst_41 {dimension_numbers = #tpu.dot_dimension_numbers<[1], [0], [0], [1], [0, 0, 1, 1], [], []>} : vector<16x16xf32>, vector<16x128xf32>, vector<16x128xf32> -> vector<16x128xf32>
    %cst_42 = arith.constant dense<0.000000e+00> : vector<16x128xf32>
    %54 = tpu.matmul %53, %48, %cst_42 {dimension_numbers = #tpu.dot_dimension_numbers<[1], [0], [0], [1], [0, 0, 1, 1], [], []>} : vector<16x128xf32>, vector<128x128xf32>, vector<16x128xf32> -> vector<16x128xf32>
    %cst_43 = arith.constant 9.99999974E-6 : f32
    %55 = vector.broadcast %cst_43 : f32 to vector<16x128xf32>
    %56 = arith.addf %54, %55 : vector<16x128xf32>
    %57 = math.rsqrt %56 : vector<16x128xf32>
    %58 = arith.mulf %51, %57 : vector<16x128xf32>
    %c1_44 = arith.constant 1 : index
    %c0_45 = arith.constant 0 : index
    %c0_46 = arith.constant 0 : index
    %59 = vector.load %arg7[%c1_44, %c0_45, %c0_46] : memref<6x1x128xf32, #tpu.memory_space<vmem>>, vector<1x1x128xf32>
    %60 = vector.shape_cast %59 : vector<1x1x128xf32> to vector<1x128xf32>
    %61 = vector.broadcast %60 : vector<1x128xf32> to vector<16x128xf32>
    %62 = arith.mulf %58, %61 : vector<16x128xf32>
    %c2_47 = arith.constant 2 : index
    %c0_48 = arith.constant 0 : index
    %c0_49 = arith.constant 0 : index
    %63 = vector.load %arg7[%c2_47, %c0_48, %c0_49] : memref<6x1x128xf32, #tpu.memory_space<vmem>>, vector<1x1x128xf32>
    %64 = vector.shape_cast %63 : vector<1x1x128xf32> to vector<1x128xf32>
    %65 = vector.broadcast %64 : vector<1x128xf32> to vector<16x128xf32>
    %66 = arith.addf %62, %65 : vector<16x128xf32>
    %cst_50 = arith.constant 0.000000e+00 : f32
    %67 = vector.broadcast %cst_50 : f32 to vector<16x128xf32>
    %68 = arith.cmpf oge, %66, %67 : vector<16x128xf32>
    %cst_51 = arith.constant 2.000000e-01 : f32
    %69 = vector.broadcast %cst_51 : f32 to vector<16x128xf32>
    %70 = arith.mulf %69, %66 : vector<16x128xf32>
    %71 = arith.select %68, %66, %70 : vector<16x128xi1>, vector<16x128xf32>
    %c0_52 = arith.constant 0 : index
    %c896 = arith.constant 896 : index
    %72 = vector.load %arg2[%c0_52, %c896] : memref<128x1792xf32, #tpu.memory_space<vmem>>, vector<128x512xf32>
    %cst_53 = arith.constant dense<0.000000e+00> : vector<16x512xf32>
    %73 = tpu.matmul %71, %72, %cst_53 {dimension_numbers = #tpu.dot_dimension_numbers<[1], [0], [0], [1], [0, 0, 1, 1], [], []>} : vector<16x128xf32>, vector<128x512xf32>, vector<16x512xf32> -> vector<16x512xf32>
    %c0_54 = arith.constant 0 : index
    %c0_55 = arith.constant 0 : index
    %c0_56 = arith.constant 0 : index
    %74 = vector.load %arg5[%c0_54, %c0_55, %c0_56] : memref<4x8x16xf32, #tpu.memory_space<vmem>>, vector<1x8x16xf32>
    %75 = vector.shape_cast %74 : vector<1x8x16xf32> to vector<8x16xf32>
    %76 = vector.extract_strided_slice %73 {offsets = [0, 0], sizes = [16, 128], strides = [1, 1]} : vector<16x512xf32> to vector<16x128xf32>
    %cst_57 = arith.constant dense<0.000000e+00> : vector<8x128xf32>
    %77 = tpu.matmul %75, %76, %cst_57 {dimension_numbers = #tpu.dot_dimension_numbers<[1], [0], [0], [1], [0, 0, 1, 1], [], []>} : vector<8x16xf32>, vector<16x128xf32>, vector<8x128xf32> -> vector<8x128xf32>
    %c1_58 = arith.constant 1 : index
    %c0_59 = arith.constant 0 : index
    %c0_60 = arith.constant 0 : index
    %78 = vector.load %arg5[%c1_58, %c0_59, %c0_60] : memref<4x8x16xf32, #tpu.memory_space<vmem>>, vector<1x8x16xf32>
    %79 = vector.shape_cast %78 : vector<1x8x16xf32> to vector<8x16xf32>
    %80 = vector.extract_strided_slice %73 {offsets = [0, 128], sizes = [16, 128], strides = [1, 1]} : vector<16x512xf32> to vector<16x128xf32>
    %cst_61 = arith.constant dense<0.000000e+00> : vector<8x128xf32>
    %81 = tpu.matmul %79, %80, %cst_61 {dimension_numbers = #tpu.dot_dimension_numbers<[1], [0], [0], [1], [0, 0, 1, 1], [], []>} : vector<8x16xf32>, vector<16x128xf32>, vector<8x128xf32> -> vector<8x128xf32>
    %82 = arith.addf %77, %81 : vector<8x128xf32>
    %c2_62 = arith.constant 2 : index
    %c0_63 = arith.constant 0 : index
    %c0_64 = arith.constant 0 : index
    %83 = vector.load %arg5[%c2_62, %c0_63, %c0_64] : memref<4x8x16xf32, #tpu.memory_space<vmem>>, vector<1x8x16xf32>
    %84 = vector.shape_cast %83 : vector<1x8x16xf32> to vector<8x16xf32>
    %85 = vector.extract_strided_slice %73 {offsets = [0, 256], sizes = [16, 128], strides = [1, 1]} : vector<16x512xf32> to vector<16x128xf32>
    %cst_65 = arith.constant dense<0.000000e+00> : vector<8x128xf32>
    %86 = tpu.matmul %84, %85, %cst_65 {dimension_numbers = #tpu.dot_dimension_numbers<[1], [0], [0], [1], [0, 0, 1, 1], [], []>} : vector<8x16xf32>, vector<16x128xf32>, vector<8x128xf32> -> vector<8x128xf32>
    %87 = arith.addf %82, %86 : vector<8x128xf32>
    %c3_66 = arith.constant 3 : index
    %c0_67 = arith.constant 0 : index
    %c0_68 = arith.constant 0 : index
    %88 = vector.load %arg5[%c3_66, %c0_67, %c0_68] : memref<4x8x16xf32, #tpu.memory_space<vmem>>, vector<1x8x16xf32>
    %89 = vector.shape_cast %88 : vector<1x8x16xf32> to vector<8x16xf32>
    %90 = vector.extract_strided_slice %73 {offsets = [0, 384], sizes = [16, 128], strides = [1, 1]} : vector<16x512xf32> to vector<16x128xf32>
    %cst_69 = arith.constant dense<0.000000e+00> : vector<8x128xf32>
    %91 = tpu.matmul %89, %90, %cst_69 {dimension_numbers = #tpu.dot_dimension_numbers<[1], [0], [0], [1], [0, 0, 1, 1], [], []>} : vector<8x16xf32>, vector<16x128xf32>, vector<8x128xf32> -> vector<8x128xf32>
    %92 = arith.addf %87, %91 : vector<8x128xf32>
    %c0_70 = arith.constant 0 : index
    %c0_71 = arith.constant 0 : index
    %93 = vector.load %arg10[%c0_70, %c0_71] : memref<8x8xf32, #tpu.memory_space<vmem>>, vector<8x8xf32>
    %c0_72 = arith.constant 0 : index
    %c0_73 = arith.constant 0 : index
    %94 = vector.load %arg11[%c0_72, %c0_73] : memref<128x128xf32, #tpu.memory_space<vmem>>, vector<128x128xf32>
    %cst_74 = arith.constant dense<0.000000e+00> : vector<8x128xf32>
    %95 = tpu.matmul %93, %92, %cst_74 {dimension_numbers = #tpu.dot_dimension_numbers<[1], [0], [0], [1], [0, 0, 1, 1], [], []>} : vector<8x8xf32>, vector<8x128xf32>, vector<8x128xf32> -> vector<8x128xf32>
    %cst_75 = arith.constant dense<0.000000e+00> : vector<8x128xf32>
    %96 = tpu.matmul %95, %94, %cst_75 {dimension_numbers = #tpu.dot_dimension_numbers<[1], [0], [0], [1], [0, 0, 1, 1], [], []>} : vector<8x128xf32>, vector<128x128xf32>, vector<8x128xf32> -> vector<8x128xf32>
    %97 = arith.subf %92, %96 : vector<8x128xf32>
    %98 = arith.mulf %97, %97 : vector<8x128xf32>
    %cst_76 = arith.constant dense<0.000000e+00> : vector<8x128xf32>
    %99 = tpu.matmul %93, %98, %cst_76 {dimension_numbers = #tpu.dot_dimension_numbers<[1], [0], [0], [1], [0, 0, 1, 1], [], []>} : vector<8x8xf32>, vector<8x128xf32>, vector<8x128xf32> -> vector<8x128xf32>
    %cst_77 = arith.constant dense<0.000000e+00> : vector<8x128xf32>
    %100 = tpu.matmul %99, %94, %cst_77 {dimension_numbers = #tpu.dot_dimension_numbers<[1], [0], [0], [1], [0, 0, 1, 1], [], []>} : vector<8x128xf32>, vector<128x128xf32>, vector<8x128xf32> -> vector<8x128xf32>
    %cst_78 = arith.constant 9.99999974E-6 : f32
    %101 = vector.broadcast %cst_78 : f32 to vector<8x128xf32>
    %102 = arith.addf %100, %101 : vector<8x128xf32>
    %103 = math.rsqrt %102 : vector<8x128xf32>
    %104 = arith.mulf %97, %103 : vector<8x128xf32>
    %c3_79 = arith.constant 3 : index
    %c0_80 = arith.constant 0 : index
    %c0_81 = arith.constant 0 : index
    %105 = vector.load %arg7[%c3_79, %c0_80, %c0_81] : memref<6x1x128xf32, #tpu.memory_space<vmem>>, vector<1x1x128xf32>
    %106 = vector.shape_cast %105 : vector<1x1x128xf32> to vector<1x128xf32>
    %107 = vector.broadcast %106 : vector<1x128xf32> to vector<8x128xf32>
    %108 = arith.mulf %104, %107 : vector<8x128xf32>
    %c4 = arith.constant 4 : index
    %c0_82 = arith.constant 0 : index
    %c0_83 = arith.constant 0 : index
    %109 = vector.load %arg7[%c4, %c0_82, %c0_83] : memref<6x1x128xf32, #tpu.memory_space<vmem>>, vector<1x1x128xf32>
    %110 = vector.shape_cast %109 : vector<1x1x128xf32> to vector<1x128xf32>
    %111 = vector.broadcast %110 : vector<1x128xf32> to vector<8x128xf32>
    %112 = arith.addf %108, %111 : vector<8x128xf32>
    %cst_84 = arith.constant 0.000000e+00 : f32
    %113 = vector.broadcast %cst_84 : f32 to vector<8x128xf32>
    %114 = arith.cmpf oge, %112, %113 : vector<8x128xf32>
    %cst_85 = arith.constant 2.000000e-01 : f32
    %115 = vector.broadcast %cst_85 : f32 to vector<8x128xf32>
    %116 = arith.mulf %115, %112 : vector<8x128xf32>
    %117 = arith.select %114, %112, %116 : vector<8x128xi1>, vector<8x128xf32>
    %c0_86 = arith.constant 0 : index
    %c1408 = arith.constant 1408 : index
    %118 = vector.load %arg2[%c0_86, %c1408] : memref<128x1792xf32, #tpu.memory_space<vmem>>, vector<128x384xf32>
    %cst_87 = arith.constant dense<0.000000e+00> : vector<8x384xf32>
    %119 = tpu.matmul %117, %118, %cst_87 {dimension_numbers = #tpu.dot_dimension_numbers<[1], [0], [0], [1], [0, 0, 1, 1], [], []>} : vector<8x128xf32>, vector<128x384xf32>, vector<8x384xf32> -> vector<8x384xf32>
    %c0_88 = arith.constant 0 : index
    %c0_89 = arith.constant 0 : index
    %c0_90 = arith.constant 0 : index
    %120 = vector.load %arg6[%c0_88, %c0_89, %c0_90] : memref<3x4x8xf32, #tpu.memory_space<vmem>>, vector<1x4x8xf32>
    %121 = vector.shape_cast %120 : vector<1x4x8xf32> to vector<4x8xf32>
    %122 = vector.extract_strided_slice %119 {offsets = [0, 0], sizes = [8, 128], strides = [1, 1]} : vector<8x384xf32> to vector<8x128xf32>
    %cst_91 = arith.constant dense<0.000000e+00> : vector<4x128xf32>
    %123 = tpu.matmul %121, %122, %cst_91 {dimension_numbers = #tpu.dot_dimension_numbers<[1], [0], [0], [1], [0, 0, 1, 1], [], []>} : vector<4x8xf32>, vector<8x128xf32>, vector<4x128xf32> -> vector<4x128xf32>
    %c1_92 = arith.constant 1 : index
    %c0_93 = arith.constant 0 : index
    %c0_94 = arith.constant 0 : index
    %124 = vector.load %arg6[%c1_92, %c0_93, %c0_94] : memref<3x4x8xf32, #tpu.memory_space<vmem>>, vector<1x4x8xf32>
    %125 = vector.shape_cast %124 : vector<1x4x8xf32> to vector<4x8xf32>
    %126 = vector.extract_strided_slice %119 {offsets = [0, 128], sizes = [8, 128], strides = [1, 1]} : vector<8x384xf32> to vector<8x128xf32>
    %cst_95 = arith.constant dense<0.000000e+00> : vector<4x128xf32>
    %127 = tpu.matmul %125, %126, %cst_95 {dimension_numbers = #tpu.dot_dimension_numbers<[1], [0], [0], [1], [0, 0, 1, 1], [], []>} : vector<4x8xf32>, vector<8x128xf32>, vector<4x128xf32> -> vector<4x128xf32>
    %128 = arith.addf %123, %127 : vector<4x128xf32>
    %c2_96 = arith.constant 2 : index
    %c0_97 = arith.constant 0 : index
    %c0_98 = arith.constant 0 : index
    %129 = vector.load %arg6[%c2_96, %c0_97, %c0_98] : memref<3x4x8xf32, #tpu.memory_space<vmem>>, vector<1x4x8xf32>
    %130 = vector.shape_cast %129 : vector<1x4x8xf32> to vector<4x8xf32>
    %131 = vector.extract_strided_slice %119 {offsets = [0, 256], sizes = [8, 128], strides = [1, 1]} : vector<8x384xf32> to vector<8x128xf32>
    %cst_99 = arith.constant dense<0.000000e+00> : vector<4x128xf32>
    %132 = tpu.matmul %130, %131, %cst_99 {dimension_numbers = #tpu.dot_dimension_numbers<[1], [0], [0], [1], [0, 0, 1, 1], [], []>} : vector<4x8xf32>, vector<8x128xf32>, vector<4x128xf32> -> vector<4x128xf32>
    %133 = arith.addf %128, %132 : vector<4x128xf32>
    %c5 = arith.constant 5 : index
    %c0_100 = arith.constant 0 : index
    %c0_101 = arith.constant 0 : index
    %134 = vector.load %arg7[%c5, %c0_100, %c0_101] : memref<6x1x128xf32, #tpu.memory_space<vmem>>, vector<1x1x128xf32>
    %135 = vector.shape_cast %134 : vector<1x1x128xf32> to vector<1x128xf32>
    %136 = vector.broadcast %135 : vector<1x128xf32> to vector<4x128xf32>
    %137 = arith.addf %133, %136 : vector<4x128xf32>
    %c0_102 = arith.constant 0 : index
    %c0_103 = arith.constant 0 : index
    %138 = vector.load %arg12[%c0_102, %c0_103] : memref<4x128xf32, #tpu.memory_space<vmem>>, vector<4x128xf32>
    tpu.vector_store %arg12[%c0_102, %c0_103], %137 {strides = array<i32>} : memref<4x128xf32, #tpu.memory_space<vmem>>, vector<4x128xf32>,
    return
  }
  func.func @transform_0(%arg0: i32) -> (i32, i32) {
    %c0_i32 = arith.constant 0 : i32
    %c0_i32_0 = arith.constant 0 : i32
    %c0_i32_1 = arith.constant 0 : i32
    return %c0_i32, %c0_i32_0 : i32, i32
  }
  func.func @transform_1(%arg0: i32) -> (i32, i32) {
    %c0_i32 = arith.constant 0 : i32
    %c0_i32_0 = arith.constant 0 : i32
    %c0_i32_1 = arith.constant 0 : i32
    return %c0_i32, %c0_i32_0 : i32, i32
  }
  func.func @transform_2(%arg0: i32) -> (i32, i32, i32) {
    %c0_i32 = arith.constant 0 : i32
    %c0_i32_0 = arith.constant 0 : i32
    %c0_i32_1 = arith.constant 0 : i32
    %c0_i32_2 = arith.constant 0 : i32
    return %c0_i32, %c0_i32_0, %c0_i32_1 : i32, i32, i32
  }
  func.func @transform_3(%arg0: i32) -> (i32, i32, i32) {
    %c0_i32 = arith.constant 0 : i32
    %c0_i32_0 = arith.constant 0 : i32
    %c0_i32_1 = arith.constant 0 : i32
    %c0_i32_2 = arith.constant 0 : i32
    return %c0_i32, %c0_i32_0, %c0_i32_1 : i32, i32, i32
  }
  func.func @transform_4(%arg0: i32) -> (i32, i32, i32) {
    %c0_i32 = arith.constant 0 : i32
    %c0_i32_0 = arith.constant 0 : i32
    %c0_i32_1 = arith.constant 0 : i32
    %c0_i32_2 = arith.constant 0 : i32
    return %c0_i32, %c0_i32_0, %c0_i32_1 : i32, i32, i32
  }
  func.func @transform_5(%arg0: i32) -> (i32, i32, i32) {
    %c0_i32 = arith.constant 0 : i32
    %c0_i32_0 = arith.constant 0 : i32
    %c0_i32_1 = arith.constant 0 : i32
    %c0_i32_2 = arith.constant 0 : i32
    return %c0_i32, %c0_i32_0, %c0_i32_1 : i32, i32, i32
  }
  func.func @transform_6(%arg0: i32) -> (i32, i32, i32) {
    %c0_i32 = arith.constant 0 : i32
    %c0_i32_0 = arith.constant 0 : i32
    %c0_i32_1 = arith.constant 0 : i32
    %c0_i32_2 = arith.constant 0 : i32
    return %c0_i32, %c0_i32_0, %c0_i32_1 : i32, i32, i32
  }
  func.func @transform_7(%arg0: i32) -> (i32, i32) {
    %c0_i32 = arith.constant 0 : i32
    %c0_i32_0 = arith.constant 0 : i32
    %c0_i32_1 = arith.constant 0 : i32
    return %c0_i32, %c0_i32_0 : i32, i32
  }
  func.func @transform_8(%arg0: i32) -> (i32, i32) {
    %c0_i32 = arith.constant 0 : i32
    %c0_i32_0 = arith.constant 0 : i32
    %c0_i32_1 = arith.constant 0 : i32
    return %c0_i32, %c0_i32_0 : i32, i32
  }
  func.func @transform_9(%arg0: i32) -> (i32, i32) {
    %c0_i32 = arith.constant 0 : i32
    %c0_i32_0 = arith.constant 0 : i32
    %c0_i32_1 = arith.constant 0 : i32
    return %c0_i32, %c0_i32_0 : i32, i32
  }
  func.func @transform_10(%arg0: i32) -> (i32, i32) {
    %c0_i32 = arith.constant 0 : i32
    %c0_i32_0 = arith.constant 0 : i32
    %c0_i32_1 = arith.constant 0 : i32
    return %c0_i32, %c0_i32_0 : i32, i32
  }
  func.func @transform_11(%arg0: i32) -> (i32, i32) {
    %c0_i32 = arith.constant 0 : i32
    %c0_i32_0 = arith.constant 0 : i32
    %c0_i32_1 = arith.constant 0 : i32
    return %c0_i32, %c0_i32_0 : i32, i32
  }
}

</mosaic_0001>

<bundles_post_ra>
// kernel: uji_discriminator_forward.1
= control target key start
LH: loop header
LB: loop body
LE: loop exit
PB: predicated region body
PF: predicated region fallthrough
CT: control target
= control target key end

     0   :  { %16 = vsyncpa [#allocation3], 0  ;;  %s1947_s0 = inlined_call_operand.vmem [shape: f32[64,128], index: 0, kind: input, shape index: {}]   ;;  %s1948_s1 = inlined_call_operand.hbm [shape: f32[128,1792], index: 1, kind: input, shape index: {}]   ;;  %s1949_s2 = inlined_call_operand.vmem [shape: f32[3,32,64], index: 2, kind: input, shape index: {}]   ;;  %s1950_s3 = inlined_call_operand.vmem [shape: f32[4,16,32], index: 3, kind: input, shape index: {}]   ;;  %s1951_s4 = inlined_call_operand.vmem [shape: f32[4,8,16], index: 4, kind: input, shape index: {}]   ;;  %s1952_s5 = inlined_call_operand.vmem [shape: f32[3,4,8], index: 5, kind: input, shape index: {}]   ;;  %s1953_s6 = inlined_call_operand.vmem [shape: f32[6,1,128], index: 6, kind: input, shape index: {}]   ;;  %s1954_s7 = inlined_call_operand.vmem [shape: f32[16,16], index: 7, kind: input, shape index: {}]   ;;  %s1955_s8 = inlined_call_operand.vmem [shape: f32[128,128], index: 8, kind: input, shape index: {}]   ;;  %s1956_s9 = inlined_call_operand.vmem [shape: f32[8,8], index: 9, kind: input, shape index: {}]   ;;  %s1957_s10 = inlined_call_operand.vmem [shape: f32[128,128], index: 10, kind: input, shape index: {}]   ;;  %s1958_s11 = inlined_call_operand.hbm [shape: f32[4,128], index: 11, kind: output, shape index: {}]  }
   0x1   :  { %17 = vsyncpa [#allocation4], 0  ;;  %s24_s19 = sshll.u32 %s1948_s1, 4  ;;  %s1589_s20 = smov [#allocation2]   ;;  %s25_s19 = int_to_ptr.hbm [resolvable:$true] %s24_s19 }
   0x2   :  { %s26_s21 = sshll.u32 %s1589_s20, 4  ;;  %s1590_s22 = smov 1792   ;;  %s27_s21 = int_to_ptr.vmem [resolvable:$true] %s26_s21 }
   0x3   :  { %s1591_s23 = smov 112  }
   0x4   :  { %32 = dma.hbm_to_vmem [thread:$0]  %s25_s19, 28672, %s27_s21, [#allocation3], %s1590_s22, %s1590_s22, %s1591_s23  }
   0x5   :  { %1585 = dma.done.wait [#allocation3], 28672  }
   0x6   :  { %1586 = vsyncadd [#allocation3], 4294938624  ;;  %v109_v0 = vld [vmem:[#allocation2 + $0x698] sm:$0xff]  ;;  %v106_v1 = vld [vmem:[#allocation2 + $0x628] sm:$0xff]  ;;  %vm243_vm0 = vcmask 523264   ;;  %vm581_vm5 = vcmask 261120  }
   0x7   :  { %152 = vmatpush.msra.mxu1 %v109_v0  ;;  %v103_v2 = vld [vmem:[#allocation2 + $0x5b8] sm:$0xff]  ;;  %v108_v3 = vld [vmem:[#allocation2 + $0x690] sm:$0xff]  ;;  %v105_v4 = vld [vmem:[#allocation2 + $0x620] sm:$0xff]  ;;  %vm726_vm6 = vcmask 130048   ;;  %vm1145_vm15 = vcmask 64512   ;;  %s1592_s30 = smov [#allocation5]  }
   0x8   :  { %111 = vmatpush.msra.mxu0 %v108_v3  ;;  %v100_v5 = vld [vmem:[#allocation2 + $0x548] sm:$0xff]  ;;  %v102_v6 = vld [vmem:[#allocation2 + $0x5b0] sm:$0xff]  ;;  %v97_v7 = vld [vmem:[#allocation2 + $0x4d8] sm:$0xff]  ;;  %s1452_s12 = sshll.u32 %s1592_s30, 4  ;;  %s1454_s15 = sshll.u32 %s1958_s11, 4  ;;  %s1453_s12 = int_to_ptr.vmem [resolvable:$true] %s1452_s12  ;;  %s1455_s15 = int_to_ptr.hbm [resolvable:$true] %s1454_s15 }
   0x9   :  { %153 = vmatpush.msra.mxu1 %v106_v1  ;;  %v99_v8 = vld [vmem:[#allocation2 + $0x540] sm:$0xff]  ;;  %v107_v10 = vld [vmem:[#allocation2 + $0x630] sm:$0xff]  ;;  %v94_v11 = vld [vmem:[#allocation2 + $0x468] sm:$0xff] }
   0xa   :  { %112 = vmatpush.msra.mxu0 %v105_v4  ;;  %v110_v9 = vld [vmem:[#allocation2 + $0x6a0] sm:$0xff]  ;;  %v96_v12 = vld [vmem:[#allocation2 + $0x4d0] sm:$0xff]  ;;  %v91_v14 = vld [vmem:[#allocation2 + $0x3f8] sm:$0xff] }
   0xb   :  { %154 = vmatpush.msra.mxu1 %v103_v2  ;;  %193 = vmatpush.msra.mxu2 %v110_v9  ;;  %v104_v13 = vld [vmem:[#allocation2 + $0x5c0] sm:$0xff]  ;;  %v101_v16 = vld [vmem:[#allocation2 + $0x550] sm:$0xff]  ;;  %v88_v17 = vld [vmem:[#allocation2 + $0x388] sm:$0xff] }
   0xc   :  { %113 = vmatpush.msra.mxu0 %v102_v6  ;;  %v93_v15 = vld [vmem:[#allocation2 + $0x460] sm:$0xff]  ;;  %v90_v18 = vld [vmem:[#allocation2 + $0x3f0] sm:$0xff]  ;;  %v85_v20 = vld [vmem:[#allocation2 + $0x318] sm:$0xff] }
   0xd   :  { %155 = vmatpush.msra.mxu1 %v100_v5  ;;  %194 = vmatpush.msra.mxu2 %v107_v10  ;;  %v98_v19 = vld [vmem:[#allocation2 + $0x4e0] sm:$0xff]  ;;  %v95_v22 = vld [vmem:[#allocation2 + $0x470] sm:$0xff]  ;;  %v82_v23 = vld [vmem:[#allocation2 + $0x2a8] sm:$0xff] }
   0xe   :  { %114 = vmatpush.msra.mxu0 %v99_v8  ;;  %v87_v21 = vld [vmem:[#allocation2 + $0x380] sm:$0xff]  ;;  %v79_v24 = vld [vmem:[#allocation2 + $0x238] sm:$0xff]  ;;  %v84_v25 = vld [vmem:[#allocation2 + $0x310] sm:$0xff] }
   0xf   :  { %156 = vmatpush.msra.mxu1 %v97_v7  ;;  %195 = vmatpush.msra.mxu2 %v104_v13  ;;  %v81_v26 = vld [vmem:[#allocation2 + $0x2a0] sm:$0xff]  ;;  %v89_v28 = vld [vmem:[#allocation2 + $0x390] sm:$0xff]  ;;  %v76_v29 = vld [vmem:[#allocation2 + $0x1c8] sm:$0xff] }
  0x10   :  { %115 = vmatpush.msra.mxu0 %v96_v12  ;;  %v92_v27 = vld [vmem:[#allocation2 + $0x400] sm:$0xff]  ;;  %v78_v30 = vld [vmem:[#allocation2 + $0x230] sm:$0xff]  ;;  %v73_v32 = vld [vmem:[#allocation2 + $0x158] sm:$0xff] }
  0x11   :  { %157 = vmatpush.msra.mxu1 %v94_v11  ;;  %196 = vmatpush.msra.mxu2 %v101_v16  ;;  %v86_v31 = vld [vmem:[#allocation2 + $0x320] sm:$0xff]  ;;  %v83_v34 = vld [vmem:[#allocation2 + $0x2b0] sm:$0xff]  ;;  %v70_v35 = vld [vmem:[#allocation2 + $0xe8] sm:$0xff] }
  0x12   :  { %116 = vmatpush.msra.mxu0 %v93_v15  ;;  %v75_v33 = vld [vmem:[#allocation2 + $0x1c0] sm:$0xff]  ;;  %v72_v36 = vld [vmem:[#allocation2 + $0x150] sm:$0xff]  ;;  %v67_v38 = vld [vmem:[#allocation2 + $0x78] sm:$0xff] }
  0x13   :  { %158 = vmatpush.msra.mxu1 %v91_v14  ;;  %197 = vmatpush.msra.mxu2 %v98_v19  ;;  %v80_v37 = vld [vmem:[#allocation2 + $0x240] sm:$0xff]  ;;  %v77_v40 = vld [vmem:[#allocation2 + $0x1d0] sm:$0xff]  ;;  %v64_v41 = vld [vmem:[#allocation2 + $0x8] sm:$0xff] }
  0x14   :  { %117 = vmatpush.msra.mxu0 %v90_v18  ;;  %v69_v39 = vld [vmem:[#allocation2 + $0xe0] sm:$0xff]  ;;  %v66_v42 = vld [vmem:[#allocation2 + $0x70] sm:$0xff]  ;;  %v56_v49 = vld [vmem:[%s1947_s0 + $0x8] sm:$0xff] }
  0x15   :  { %159 = vmatpush.msra.mxu1 %v88_v17  ;;  %198 = vmatpush.msra.mxu2 %v95_v22  ;;  %v55_v43 = vld [vmem:[%s1947_s0] sm:$0xff]  ;;  %v71_v46 = vld [vmem:[#allocation2 + $0xf0] sm:$0xff]  ;;  %v58_v51 = vld [vmem:[%s1947_s0 + $0x18] sm:$0xff] }
  0x16   :  { %118 = vmatpush.msra.mxu0 %v87_v21  ;;  %v74_v44 = vld [vmem:[#allocation2 + $0x160] sm:$0xff]  ;;  %v65_v48 = vld [vmem:[#allocation2 + $0x10] sm:$0xff]  ;;  %v60_v53 = vld [vmem:[%s1947_s0 + $0x28] sm:$0xff] }
  0x17   :  { %160 = vmatpush.msra.mxu1 %v85_v20  ;;  %199 = vmatpush.msra.mxu2 %v92_v27  ;;  %v63_v45 = vld [vmem:[#allocation2] sm:$0xff]  ;;  %v57_v50 = vld [vmem:[%s1947_s0 + $0x10] sm:$0xff]  ;;  %v62_v55 = vld [vmem:[%s1947_s0 + $0x38] sm:$0xff] }
  0x18   :  { %119 = vmatpush.msra.mxu0 %v84_v25  ;;  %v68_v47 = vld [vmem:[#allocation2 + $0x80] sm:$0xff]  ;;  %v61_v54 = vld [vmem:[%s1947_s0 + $0x30] sm:$0xff]  ;;  %v1465_v16 = vld [vmem:[%s1949_s2 + $0x28] sm:$0xff] }
  0x19   :  { %161 = vmatpush.msra.mxu1 %v82_v23  ;;  %200 = vmatpush.msra.mxu2 %v89_v28  ;;  %v59_v52 = vld [vmem:[%s1947_s0 + $0x20] sm:$0xff]  ;;  %v1466_v18 = vld [vmem:[%s1949_s2 + $0x30] sm:$0xff]  ;;  %v1467_v19 = vld [vmem:[%s1949_s2 + $0x38] sm:$0xff] }
  0x1a   :  { %120 = vmatpush.msra.mxu0 %v81_v26  ;;  %v1464_v13 = vld [vmem:[%s1949_s2 + $0x20] sm:$0xff]  ;;  %v235_v21 = vld [vmem:[%s1949_s2 + $0x8] sm:$0xff]  ;;  %v236_v22 = vld [vmem:[%s1949_s2 + $0x10] sm:$0xff] }
  0x1b   :  { %162 = vmatpush.msra.mxu1 %v79_v24  ;;  %201 = vmatpush.msra.mxu2 %v86_v31  ;;  %v234_v20 = vld [vmem:[%s1949_s2] sm:$0xff]  ;;  %v237_v23 = vld [vmem:[%s1949_s2 + $0x18] sm:$0xff]  ;;  %v1477_v25 = vld [vmem:[%s1949_s2 + $0x48] sm:$0xff] }
  0x1c   :  { %121 = vmatpush.msra.mxu0 %v78_v30  ;;  %v1476_v24 = vld [vmem:[%s1949_s2 + $0x40] sm:$0xff]  ;;  %v1478_v26 = vld [vmem:[%s1949_s2 + $0x50] sm:$0xff]  ;;  %v1479_v27 = vld [vmem:[%s1949_s2 + $0x58] sm:$0xff] }
  0x1d   :  { %163 = vmatpush.msra.mxu1 %v76_v29  ;;  %202 = vmatpush.msra.mxu2 %v83_v34  ;;  %v457_v29 = vld [vmem:[#allocation2 + $0x6b0] sm:$0xff]  ;;  %v458_v30 = vld [vmem:[#allocation2 + $0x6b8] sm:$0xff]  ;;  %v453_v31 = vld [vmem:[#allocation2 + $0x640] sm:$0xff] }
  0x1e   :  { %122 = vmatpush.msra.mxu0 %v75_v33  ;;  %v456_v34 = vld [vmem:[#allocation2 + $0x6a8] sm:$0xff] }
  0x1f   :  { %164 = vmatpush.msra.mxu1 %v73_v32  ;;  %203 = vmatpush.msra.mxu2 %v80_v37  ;;  %v454_v32 = vld [vmem:[#allocation2 + $0x648] sm:$0xff]  ;;  %v452_v37 = vld [vmem:[#allocation2 + $0x638] sm:$0xff] }
  0x20   :  { %123 = vmatpush.msra.mxu0 %v72_v36  ;;  %v449_v36 = vld [vmem:[#allocation2 + $0x5d0] sm:$0xff] }
  0x21   :  { %165 = vmatpush.msra.mxu1 %v70_v35  ;;  %204 = vmatpush.msra.mxu2 %v77_v40  ;;  %v459_v35 = vld [vmem:[#allocation2 + $0x6c0] sm:$0xff]  ;;  %v448_v40 = vld [vmem:[#allocation2 + $0x5c8] sm:$0xff] }
  0x22   :  { %124 = vmatpush.msra.mxu0 %v69_v39  ;;  %v455_v39 = vld [vmem:[#allocation2 + $0x650] sm:$0xff] }
  0x23   :  { %166 = vmatpush.msra.mxu1 %v67_v38  ;;  %205 = vmatpush.msra.mxu2 %v74_v44  ;;  %v450_v38 = vld [vmem:[#allocation2 + $0x5d8] sm:$0xff] }
  0x24   :  { %125 = vmatpush.msra.mxu0 %v66_v42  ;;  %v451_v42 = vld [vmem:[#allocation2 + $0x5e0] sm:$0xff]  ;;  %v444_v44 = vld [vmem:[#allocation2 + $0x558] sm:$0xff] }
  0x25   :  { %167 = vmatpush.msra.mxu1 %v64_v41  ;;  %206 = vmatpush.msra.mxu2 %v71_v46  ;;  %v445_v41 = vld [vmem:[#allocation2 + $0x560] sm:$0xff] }
  0x26   :  { %168 = vmatmul.f32.vlgmr.msra.gmra.mxu1 %v55_v43  ;;  %126 = vmatpush.msra.mxu0 %v63_v45  ;;  %v447_v45 = vld [vmem:[#allocation2 + $0x570] sm:$0xff] }
  0x27   :  { %127 = vmatmul.f32.vlgmr.msra.gmra.mxu0 %v55_v43  ;;  %207 = vmatpush.msra.mxu2 %v68_v47  ;;  %v440_v47 = vld [vmem:[#allocation2 + $0x4e8] sm:$0xff] }
  0x28   :  { %489 = vmatpush.msrb.mxu1 %v457_v29  ;;  %460 = vmatpush.msrb.mxu0 %v456_v34  ;;  %v403_v29 = vld [vmem:[#allocation2 + $0xa0] sm:$0xff]  ;;  %v399_v34 = vld [vmem:[#allocation2 + $0x30] sm:$0xff] }
  0x29   :  { %208 = vmatpush.msra.mxu2 %v65_v48  ;;  %v441_v48 = vld [vmem:[#allocation2 + $0x4f0] sm:$0xff] }
  0x2a   :  { %209 = vmatmul.f32.vlgmr.msra.gmra.mxu2 %v55_v43  ;;  %490 = vmatpush.msrb.mxu1 %v453_v31  ;;  %v446_v43 = vld [vmem:[#allocation2 + $0x568] sm:$0xff]  ;;  %v397_v31 = vld [vmem:[#allocation2 + $0x20] sm:$0xff] }
  0x2b   :  { %518 = vmatpush.msrb.mxu2 %v458_v30  ;;  %461 = vmatpush.msrb.mxu0 %v452_v37  ;;  %v396_v30 = vld [vmem:[#allocation2 + $0x18] sm:$0xff] }
  0x2c   :  { %491 = vmatpush.msrb.mxu1 %v449_v36 }
  0x2d   :  { %519 = vmatpush.msrb.mxu2 %v454_v32  ;;  %462 = vmatpush.msrb.mxu0 %v448_v40  ;;  %v398_v32 = vld [vmem:[#allocation2 + $0x28] sm:$0xff] }
  0x2e   :  { %171 = vmatmul.f32.gmra.mxu1 %v56_v49 }
  0x2f   :  { %130 = vmatmul.f32.gmra.mxu0 %v56_v49  ;;  %520 = vmatpush.msrb.mxu2 %v450_v38 }
  0x30   :  { %492 = vmatpush.msrb.mxu1 %v445_v41  ;;  %463 = vmatpush.msrb.mxu0 %v444_v44 }
  0x31   :  { %521 = vmatpush.msrb.mxu2 %v446_v43 }
  0x32   :  { %212 = vmatmul.f32.gmra.mxu2 %v56_v49  ;;  %v442_v49 = vld [vmem:[#allocation2 + $0x4f8] sm:$0xff]  ;;  %464 = vmatpush.msrb.mxu0 %v440_v47 }
  0x33   :  { %493 = vmatpush.msrb.mxu1 %v441_v48  ;;  %522 = vmatpush.msrb.mxu2 %v442_v49 }
  0x36   :  { %174 = vmatmul.f32.gmra.mxu1 %v57_v50 }
  0x37   :  { %133 = vmatmul.f32.gmra.mxu0 %v57_v50 }
  0x3a   :  { %215 = vmatmul.f32.gmra.mxu2 %v57_v50  ;;  %v443_v50 = vld [vmem:[#allocation2 + $0x500] sm:$0xff] }
  0x3e   :  { %177 = vmatmul.f32.gmra.mxu1 %v58_v51 }
  0x3f   :  { %136 = vmatmul.f32.gmra.mxu0 %v58_v51 }
  0x42   :  { %218 = vmatmul.f32.gmra.mxu2 %v58_v51  ;;  %v436_v51 = vld [vmem:[#allocation2 + $0x478] sm:$0xff] }
  0x43   :  { %465 = vmatpush.msrb.mxu0 %v436_v51 }
  0x46   :  { %180 = vmatmul.f32.gmra.mxu1 %v59_v52 }
  0x47   :  { %139 = vmatmul.f32.gmra.mxu0 %v59_v52 }
  0x4a   :  { %221 = vmatmul.f32.gmra.mxu2 %v59_v52  ;;  %v437_v52 = vld [vmem:[#allocation2 + $0x480] sm:$0xff] }
  0x4b   :  { %494 = vmatpush.msrb.mxu1 %v437_v52 }
  0x4e   :  { %183 = vmatmul.f32.gmra.mxu1 %v60_v53 }
  0x4f   :  { %142 = vmatmul.f32.gmra.mxu0 %v60_v53 }
  0x52   :  { %224 = vmatmul.f32.gmra.mxu2 %v60_v53  ;;  %v438_v53 = vld [vmem:[#allocation2 + $0x488] sm:$0xff] }
  0x53   :  { %523 = vmatpush.msrb.mxu2 %v438_v53 }
  0x56   :  { %186 = vmatmul.f32.gmra.mxu1 %v61_v54 }
  0x57   :  { %145 = vmatmul.f32.gmra.mxu0 %v61_v54 }
  0x5a   :  { %227 = vmatmul.f32.gmra.mxu2 %v61_v54  ;;  %v439_v54 = vld [vmem:[#allocation2 + $0x490] sm:$0xff] }
  0x5e   :  { %189 = vmatmul.f32.gmra.mxu1 %v62_v55 }
  0x5f   :  { %148 = vmatmul.f32.gmra.mxu0 %v62_v55 }
  0x62   :  { %230 = vmatmul.f32.gmra.mxu2 %v62_v55  ;;  %v432_v55 = vld [vmem:[#allocation2 + $0x408] sm:$0xff] }
  0x63   :  { %466 = vmatpush.msrb.mxu0 %v432_v55 }
  0xa3   :  { %v169_v56 = vpop.f32.mrf.mxu1 }
  0xa4   :  { %v128_v57 = vpop.f32.mrf.mxu0 }
  0xab   :  { %v172_v58 = vpop.f32.mrf.mxu1 }
  0xac   :  { %v131_v59 = vpop.f32.mrf.mxu0 }
  0xad   :  { %v210_v60 = vpop.f32.mrf.mxu2 }
  0xb3   :  { %v175_v61 = vpop.f32.mrf.mxu1 }
  0xb4   :  { %v134_v62 = vpop.f32.mrf.mxu0 }
  0xb5   :  { %v213_v0 = vpop.f32.mrf.mxu2 }
  0xbb   :  { %v178_v63 = vpop.f32.mrf.mxu1 }
  0xbc   :  { %v137_v1 = vpop.f32.mrf.mxu0 }
  0xbd   :  { %v216_v3 = vpop.f32.mrf.mxu2 }
  0xc3   :  { %v181_v2 = vpop.f32.mrf.mxu1 }
  0xc4   :  { %v140_v5 = vpop.f32.mrf.mxu0 }
  0xc5   :  { %v219_v6 = vpop.f32.mrf.mxu2 }
  0xcb   :  { %v184_v4 = vpop.f32.mrf.mxu1 }
  0xcc   :  { %v143_v8 = vpop.f32.mrf.mxu0 }
  0xcd   :  { %v222_v9 = vpop.f32.mrf.mxu2 }
  0xd3   :  { %v187_v7 = vpop.f32.mrf.mxu1 }
  0xd4   :  { %v146_v11 = vpop.f32.mrf.mxu0 }
  0xd5   :  { %v225_v12 = vpop.f32.mrf.mxu2 }
  0xdb   :  { %v190_v10 = vpop.f32.mrf.mxu1 }
  0xdc   :  { %264 = vmatpush.msra.mxu3 %v190_v10  ;;  %v149_v14 = vpop.f32.mrf.mxu0  ;;  %v418_v10 = vld [vmem:[#allocation2 + $0x258] sm:$0xff] }
  0xdd   :  { %v228_v15 = vpop.f32.mrf.mxu2 }
  0xde   :  { %265 = vmatpush.msra.mxu3 %v187_v7  ;;  %v423_v7 = vld [vmem:[#allocation2 + $0x2d0] sm:$0xff] }
  0xe0   :  { %266 = vmatpush.msra.mxu3 %v184_v4  ;;  %v420_v4 = vld [vmem:[#allocation2 + $0x2b8] sm:$0xff] }
  0xe2   :  { %267 = vmatpush.msra.mxu3 %v181_v2  ;;  %v426_v2 = vld [vmem:[#allocation2 + $0x338] sm:$0xff] }
  0xe4   :  { %268 = vmatpush.msra.mxu3 %v178_v63 }
  0xe5   :  { %v231_v17 = vpop.f32.mrf.mxu2 }
  0xe6   :  { %269 = vmatpush.msra.mxu3 %v175_v61  ;;  %v430_v61 = vld [vmem:[#allocation2 + $0x3a8] sm:$0xff] }
  0xe8   :  { %270 = vmatpush.msra.mxu3 %v172_v58  ;;  %v435_v58 = vld [vmem:[#allocation2 + $0x420] sm:$0xff] }
  0xea   :  { %271 = vmatpush.msra.mxu3 %v169_v56  ;;  %v433_v56 = vld [vmem:[#allocation2 + $0x410] sm:$0xff] }
  0xeb   :  { %1468 = vmatmul.msk.f32.vlgmr.msra.gmra.mxu3 %vm243_vm0, %v1464_v13  ;;  %495 = vmatpush.msrb.mxu1 %v433_v56  ;;  %v413_v13 = vld [vmem:[#allocation2 + $0x1e0] sm:$0xff] }
  0xec   :  { %305 = vmatpush.msrb.mxu3 %v149_v14  ;;  %v414_v14 = vld [vmem:[#allocation2 + $0x1e8] sm:$0xff] }
  0xee   :  { %306 = vmatpush.msrb.mxu3 %v146_v11  ;;  %v419_v11 = vld [vmem:[#allocation2 + $0x260] sm:$0xff] }
  0xf0   :  { %307 = vmatpush.msrb.mxu3 %v143_v8  ;;  %v416_v8 = vld [vmem:[#allocation2 + $0x248] sm:$0xff] }
  0xf2   :  { %308 = vmatpush.msrb.mxu3 %v140_v5  ;;  %v421_v5 = vld [vmem:[#allocation2 + $0x2c0] sm:$0xff] }
  0xf3   :  { %1469 = vmatmul.msk.f32.gmra.mxu3 %vm243_vm0, %v1465_v16 }
  0xf4   :  { %309 = vmatpush.msrb.mxu3 %v137_v1  ;;  %v425_v1 = vld [vmem:[#allocation2 + $0x330] sm:$0xff] }
  0xf6   :  { %310 = vmatpush.msrb.mxu3 %v134_v62  ;;  %v431_v62 = vld [vmem:[#allocation2 + $0x3b0] sm:$0xff] }
  0xf8   :  { %311 = vmatpush.msrb.mxu3 %v131_v59  ;;  %v428_v59 = vld [vmem:[#allocation2 + $0x398] sm:$0xff] }
  0xf9   :  { %467 = vmatpush.msrb.mxu0 %v428_v59 }
  0xfa   :  { %312 = vmatpush.msrb.mxu3 %v128_v57  ;;  %v434_v57 = vld [vmem:[#allocation2 + $0x418] sm:$0xff] }
  0xfb   :  { %1470 = vmatmul.msk.f32.gmra.mxu3 %vm243_vm0, %v1466_v18  ;;  %524 = vmatpush.msrb.mxu2 %v434_v57  ;;  %v409_v18 = vld [vmem:[#allocation2 + $0x170] sm:$0xff] }
  0xfc   :  { %351 = vmatpush.msra.mxu3 %v231_v17  ;;  %v408_v17 = vld [vmem:[#allocation2 + $0x168] sm:$0xff] }
  0xfd   :  { %525 = vmatpush.msrb.mxu2 %v430_v61 }
  0xfe   :  { %352 = vmatpush.msra.mxu3 %v228_v15  ;;  %v415_v15 = vld [vmem:[#allocation2 + $0x1f0] sm:$0xff] }
  0xff   :  { %526 = vmatpush.msrb.mxu2 %v426_v2 }
 0x100   :  { %353 = vmatpush.msra.mxu3 %v225_v12  ;;  %v412_v12 = vld [vmem:[#allocation2 + $0x1d8] sm:$0xff] }
 0x102   :  { %354 = vmatpush.msra.mxu3 %v222_v9  ;;  %v417_v9 = vld [vmem:[#allocation2 + $0x250] sm:$0xff] }
 0x103   :  { %1471 = vmatmul.msk.f32.gmra.mxu3 %vm243_vm0, %v1467_v19  ;;  %v410_v19 = vld [vmem:[#allocation2 + $0x178] sm:$0xff] }
 0x104   :  { %355 = vmatpush.msra.mxu3 %v219_v6  ;;  %v422_v6 = vld [vmem:[#allocation2 + $0x2c8] sm:$0xff] }
 0x105   :  { %527 = vmatpush.msrb.mxu2 %v422_v6 }
 0x106   :  { %356 = vmatpush.msra.mxu3 %v216_v3  ;;  %v427_v3 = vld [vmem:[#allocation2 + $0x340] sm:$0xff] }
 0x107   :  { %528 = vmatpush.msrb.mxu2 %v418_v10 }
 0x108   :  { %357 = vmatpush.msra.mxu3 %v213_v0  ;;  %v424_v0 = vld [vmem:[#allocation2 + $0x328] sm:$0xff] }
 0x109   :  { %468 = vmatpush.msrb.mxu0 %v424_v0  ;;  %529 = vmatpush.msrb.mxu2 %v414_v14 }
 0x10a   :  { %358 = vmatpush.msra.mxu3 %v210_v60  ;;  %v429_v60 = vld [vmem:[#allocation2 + $0x3a0] sm:$0xff] }
 0x10b   :  { %1472 = vmatmul.msk.f32.vlgmr.msrb.gmra.mxu3 %vm243_vm0, %v234_v20  ;;  %496 = vmatpush.msrb.mxu1 %v429_v60  ;;  %v411_v20 = vld [vmem:[#allocation2 + $0x180] sm:$0xff] }
 0x10c   :  { %547 = vmatpush.msrb.mxu3 %v459_v35  ;;  %469 = vmatpush.msrb.mxu0 %v420_v4 }
 0x10d   :  { %497 = vmatpush.msrb.mxu1 %v425_v1  ;;  %530 = vmatpush.msrb.mxu2 %v410_v19  ;;  %v1494_v19 = vld [vmem:[%s1950_s3 + $0x30] sm:$0xff] }
 0x10e   :  { %548 = vmatpush.msrb.mxu3 %v455_v39  ;;  %470 = vmatpush.msrb.mxu0 %v416_v8  ;;  %v1525_v39 = vld [vmem:[%s1953_s6] ss:$0 sm:$0xff] }
 0x10f   :  { %498 = vmatpush.msrb.mxu1 %v421_v5 }
 0x110   :  { %549 = vmatpush.msrb.mxu3 %v451_v42  ;;  %471 = vmatpush.msrb.mxu0 %v412_v12  ;;  %v576_v12 = vld [vmem:[%s1950_s3] sm:$0xff] }
 0x111   :  { %499 = vmatpush.msrb.mxu1 %v417_v9 }
 0x112   :  { %550 = vmatpush.msrb.mxu3 %v447_v45  ;;  %472 = vmatpush.msrb.mxu0 %v408_v17  ;;  %v577_v17 = vld [vmem:[%s1950_s3 + $0x8] sm:$0xff] }
 0x113   :  { %1473 = vmatmul.msk.f32.gmra.mxu3 %vm243_vm0, %v235_v21  ;;  %500 = vmatpush.msrb.mxu1 %v413_v13  ;;  %v404_v21 = vld [vmem:[#allocation2 + $0xf8] sm:$0xff] }
 0x114   :  { %551 = vmatpush.msrb.mxu3 %v443_v50  ;;  %473 = vmatpush.msrb.mxu0 %v404_v21 }
 0x115   :  { %501 = vmatpush.msrb.mxu1 %v409_v18  ;;  %v1491_v18 = vld [vmem:[%s1950_s3 + $0x28] sm:$0xff] }
 0x116   :  { %552 = vmatpush.msrb.mxu3 %v439_v54 }
 0x118   :  { %553 = vmatpush.msrb.mxu3 %v435_v58 }
 0x11a   :  { %554 = vmatpush.msrb.mxu3 %v431_v62 }
 0x11b   :  { %1474 = vmatmul.msk.f32.gmra.mxu3 %vm243_vm0, %v236_v22  ;;  %v405_v22 = vld [vmem:[#allocation2 + $0x100] sm:$0xff] }
 0x11c   :  { %555 = vmatpush.msrb.mxu3 %v427_v3  ;;  %502 = vmatpush.msrb.mxu1 %v405_v22  ;;  %v725_v22 = vld [vmem:[%s1955_s8 + $0x78] sm:$0xff] }
 0x11e   :  { %556 = vmatpush.msrb.mxu3 %v423_v7 }
 0x120   :  { %557 = vmatpush.msrb.mxu3 %v419_v11  ;;  %v1484_v11 = vld [vmem:[%s1950_s3 + $0x10] sm:$0xff] }
 0x122   :  { %558 = vmatpush.msrb.mxu3 %v415_v15  ;;  %v1490_v15 = vld [vmem:[%s1950_s3 + $0x20] sm:$0xff] }
 0x123   :  { %1475 = vmatmul.msk.f32.gmra.mxu3 %vm243_vm0, %v237_v23  ;;  %v406_v23 = vld [vmem:[#allocation2 + $0x108] sm:$0xff] }
 0x124   :  { %559 = vmatpush.msrb.mxu3 %v411_v20  ;;  %531 = vmatpush.msrb.mxu2 %v406_v23  ;;  %v1495_v20 = vld [vmem:[%s1950_s3 + $0x38] sm:$0xff]  ;;  %v724_v23 = vld [vmem:[%s1955_s8 + $0x70] sm:$0xff] }
 0x12b   :  { %1480 = vmatmul.msk.f32.vlgmr.msra.gmra.mxu3 %vm243_vm0, %v1476_v24  ;;  %v407_v24 = vld [vmem:[#allocation2 + $0x110] sm:$0xff] }
 0x12c   :  { %560 = vmatpush.msrb.mxu3 %v407_v24 }
 0x12e   :  { %561 = vmatpush.msrb.mxu3 %v403_v29  ;;  %v721_v29 = vld [vmem:[%s1955_s8 + $0x58] sm:$0xff] }
 0x130   :  { %562 = vmatpush.msrb.mxu3 %v399_v34  ;;  %v719_v34 = vld [vmem:[%s1955_s8 + $0x48] sm:$0xff] }
 0x132   :  { %756 = vmatpush.msra.mxu3 %v725_v22 }
 0x133   :  { %1481 = vmatmul.msk.f32.gmra.mxu3 %vm243_vm0, %v1477_v25  ;;  %v400_v25 = vld [vmem:[#allocation2 + $0x88] sm:$0xff] }
 0x134   :  { %474 = vmatpush.msrb.mxu0 %v400_v25  ;;  %757 = vmatpush.msra.mxu3 %v724_v23 }
 0x136   :  { %475 = vmatpush.msrb.mxu0 %v396_v30 }
 0x13b   :  { %1482 = vmatmul.msk.f32.gmra.mxu3 %vm243_vm0, %v1478_v26  ;;  %v401_v26 = vld [vmem:[#allocation2 + $0x90] sm:$0xff] }
 0x13c   :  { %503 = vmatpush.msrb.mxu1 %v401_v26  ;;  %v723_v26 = vld [vmem:[%s1955_s8 + $0x68] sm:$0xff] }
 0x13d   :  { %758 = vmatpush.msra.mxu3 %v723_v26 }
 0x13e   :  { %504 = vmatpush.msrb.mxu1 %v397_v31  ;;  %v720_v31 = vld [vmem:[%s1955_s8 + $0x50] sm:$0xff] }
 0x143   :  { %1483 = vmatmul.msk.f32.gmra.mxu3 %vm243_vm0, %v1479_v27  ;;  %v402_v27 = vld [vmem:[#allocation2 + $0x98] sm:$0xff] }
 0x144   :  { %532 = vmatpush.msrb.mxu2 %v402_v27  ;;  %v722_v27 = vld [vmem:[%s1955_s8 + $0x60] sm:$0xff] }
 0x145   :  { %759 = vmatpush.msra.mxu3 %v722_v27 }
 0x146   :  { %533 = vmatpush.msrb.mxu2 %v398_v32 }
 0x147   :  { %760 = vmatpush.msra.mxu3 %v721_v29 }
 0x149   :  { %761 = vmatpush.msra.mxu3 %v720_v31 }
 0x14b   :  { %762 = vmatpush.msra.mxu3 %v719_v34 }
 0x16e   :  { %v1728_v28 = vpop.f32.mrf.mxu3 }
 0x176   :  { %v1730_v33 = vpop.f32.mrf.mxu3 }
 0x17e   :  { %v1732_v46 = vpop.f32.mrf.mxu3 }
 0x186   :  { %v1734_v63 = vpop.f32.mrf.mxu3 }
 0x18e   :  { %v314_v16 = vpop.f32.mrf.mxu3 }
 0x18f   :  { %v315_v38 = vadd.f32 %v314_v16, %v1728_v28  ;;  %v1485_v16 = vld [vmem:[%s1950_s3 + $0x18] sm:$0xff] }
 0x196   :  { %v317_v35 = vpop.f32.mrf.mxu3 }
 0x197   :  { %v318_v44 = vadd.f32 %v317_v35, %v1730_v33 }
 0x19e   :  { %v320_v36 = vpop.f32.mrf.mxu3 }
 0x19f   :  { %v321_v50 = vadd.f32 %v320_v36, %v1732_v46  ;;  %v718_v36 = vld [vmem:[%s1955_s8 + $0x40] sm:$0xff] }
 0x1a0   :  { %763 = vmatpush.msra.mxu3 %v718_v36 }
 0x1a6   :  { %v323_v37 = vpop.f32.mrf.mxu3 }
 0x1a7   :  { %v324_v55 = vadd.f32 %v323_v37, %v1734_v63  ;;  %v717_v37 = vld [vmem:[%s1955_s8 + $0x38] sm:$0xff] }
 0x1a8   :  { %764 = vmatpush.msra.mxu3 %v717_v37 }
 0x1ae   :  { %v360_v40 = vpop.f32.mrf.mxu3 }
 0x1af   :  { %v372_v41 = vadd.f32 %v360_v40, %v315_v38  ;;  %v716_v40 = vld [vmem:[%s1955_s8 + $0x30] sm:$0xff] }
 0x1b0   :  { %765 = vmatpush.msra.mxu3 %v716_v40 }
 0x1b1   :  { %v380_v42 = vadd.f32 %v1525_v39, %v372_v41 }
 0x1b3   :  { %v388_v43 = vmul.f32 0.2, %v380_v42  ;;  %vm384_vm1 = vcmp.ge.f32.partialorder %v380_v42, 0.0 }
 0x1b5   :  { %v392_v45 = vsel %vm384_vm1, %v380_v42, %v388_v43 }
 0x1b6   :  { %v363_v47 = vpop.f32.mrf.mxu3  ;;  %476 = vmatmul.f32.vlgmr.msrb.gmra.mxu0 %v392_v45  ;;  %505 = vmatmul.f32.vlgmr.msrb.gmra.mxu1 %v392_v45 }
 0x1b7   :  { %v373_v48 = vadd.f32 %v363_v47, %v318_v44  ;;  %534 = vmatmul.f32.vlgmr.msrb.gmra.mxu2 %v392_v45  ;;  %563 = vmatmul.f32.vlgmr.msrb.gmra.mxu3 %v392_v45  ;;  %v715_v44 = vld [vmem:[%s1955_s8 + $0x28] sm:$0xff] }
 0x1b8   :  { %766 = vmatpush.msra.mxu3 %v715_v44 }
 0x1b9   :  { %v381_v49 = vadd.f32 %v1525_v39, %v373_v48  ;;  %v714_v48 = vld [vmem:[%s1955_s8 + $0x20] sm:$0xff] }
 0x1ba   :  { %767 = vmatpush.msra.mxu3 %v714_v48 }
 0x1bb   :  { %v389_v28 = vmul.f32 0.2, %v381_v49  ;;  %vm385_vm2 = vcmp.ge.f32.partialorder %v381_v49, 0.0 }
 0x1bd   :  { %v393_v51 = vsel %vm385_vm2, %v381_v49, %v389_v28  ;;  %v708_v28 = vld [vmem:[%s1954_s7] sm:$0xff] }
 0x1be   :  { %v366_v52 = vpop.f32.mrf.mxu3  ;;  %479 = vmatmul.f32.gmra.mxu0 %v393_v51  ;;  %508 = vmatmul.f32.gmra.mxu1 %v393_v51 }
 0x1bf   :  { %v374_v53 = vadd.f32 %v366_v52, %v321_v50  ;;  %537 = vmatmul.f32.gmra.mxu2 %v393_v51  ;;  %566 = vmatmul.f32.gmra.mxu3 %v393_v51  ;;  %v713_v50 = vld [vmem:[%s1955_s8 + $0x18] sm:$0xff]  ;;  %v712_v51 = vld [vmem:[%s1955_s8 + $0x10] sm:$0xff]  ;;  %v711_v52 = vld [vmem:[%s1955_s8 + $0x8] sm:$0xff] }
 0x1c0   :  { %768 = vmatpush.msra.mxu3 %v713_v50 }
 0x1c1   :  { %v382_v33 = vadd.f32 %v1525_v39, %v374_v53  ;;  %v709_v53 = vld [vmem:[%s1954_s7 + $0x8] sm:$0xff] }
 0x1c2   :  { %769 = vmatpush.msra.mxu3 %v712_v51 }
 0x1c3   :  { %v390_v54 = vmul.f32 0.2, %v382_v33  ;;  %vm386_vm3 = vcmp.ge.f32.partialorder %v382_v33, 0.0 }
 0x1c4   :  { %770 = vmatpush.msra.mxu3 %v711_v52 }
 0x1c5   :  { %v394_v56 = vsel %vm386_vm3, %v382_v33, %v390_v54  ;;  %v710_v33 = vld [vmem:[%s1955_s8] sm:$0xff] }
 0x1c6   :  { %v369_v57 = vpop.f32.mrf.mxu3  ;;  %482 = vmatmul.f32.gmra.mxu0 %v394_v56  ;;  %511 = vmatmul.f32.gmra.mxu1 %v394_v56 }
 0x1c7   :  { %v375_v58 = vadd.f32 %v369_v57, %v324_v55  ;;  %540 = vmatmul.f32.gmra.mxu2 %v394_v56  ;;  %569 = vmatmul.f32.gmra.mxu3 %v394_v56 }
 0x1c8   :  { %771 = vmatpush.msra.mxu3 %v710_v33 }
 0x1c9   :  { %v383_v46 = vadd.f32 %v1525_v39, %v375_v58 }
 0x1cb   :  { %v391_v59 = vmul.f32 0.2, %v383_v46  ;;  %vm387_vm4 = vcmp.ge.f32.partialorder %v383_v46, 0.0 }
 0x1cd   :  { %v395_v60 = vsel %vm387_vm4, %v383_v46, %v391_v59 }
 0x1ce   :  { %485 = vmatmul.f32.gmra.mxu0 %v395_v60  ;;  %514 = vmatmul.f32.gmra.mxu1 %v395_v60 }
 0x1cf   :  { %543 = vmatmul.f32.gmra.mxu2 %v395_v60  ;;  %572 = vmatmul.f32.gmra.mxu3 %v395_v60 }
 0x233   :  { %v477_v61 = vpop.f32.mrf.mxu0  ;;  %v506_v62 = vpop.f32.mrf.mxu1 }
 0x23a   :  { %v535_v0 = vpop.f32.mrf.mxu2  ;;  %v564_v1 = vpop.f32.mrf.mxu3 }
 0x23b   :  { %v480_v63 = vpop.f32.mrf.mxu0  ;;  %v509_v2 = vpop.f32.mrf.mxu1 }
 0x242   :  { %v538_v3 = vpop.f32.mrf.mxu2  ;;  %v567_v4 = vpop.f32.mrf.mxu3 }
 0x243   :  { %v483_v5 = vpop.f32.mrf.mxu0  ;;  %v512_v6 = vpop.f32.mrf.mxu1 }
 0x24a   :  { %v541_v7 = vpop.f32.mrf.mxu2  ;;  %v570_v8 = vpop.f32.mrf.mxu3 }
 0x24b   :  { %v486_v9 = vpop.f32.mrf.mxu0  ;;  %v515_v10 = vpop.f32.mrf.mxu1 }
 0x24c   :  { %600 = vmatpush.msra.mxu0 %v515_v10  ;;  %629 = vmatpush.msra.mxu1 %v486_v9  ;;  %v925_v9 = vld [vmem:[#allocation2 + $0x5f8] sm:$0xff]  ;;  %v926_v10 = vld [vmem:[#allocation2 + $0x600] sm:$0xff] }
 0x24e   :  { %601 = vmatpush.msra.mxu0 %v512_v6  ;;  %630 = vmatpush.msra.mxu1 %v483_v5  ;;  %v929_v5 = vld [vmem:[#allocation2 + $0x668] sm:$0xff]  ;;  %v930_v6 = vld [vmem:[#allocation2 + $0x670] sm:$0xff] }
 0x250   :  { %602 = vmatpush.msra.mxu0 %v509_v2  ;;  %631 = vmatpush.msra.mxu1 %v480_v63 }
 0x252   :  { %v544_v13 = vpop.f32.mrf.mxu2  ;;  %v573_v14 = vpop.f32.mrf.mxu3  ;;  %603 = vmatpush.msra.mxu0 %v506_v62  ;;  %632 = vmatpush.msra.mxu1 %v477_v61  ;;  %v931_v61 = vld [vmem:[#allocation2 + $0x6c8] sm:$0xff]  ;;  %v932_v62 = vld [vmem:[#allocation2 + $0x6d0] sm:$0xff] }
 0x253   :  { %661 = vmatpush.msra.mxu2 %v544_v13  ;;  %1486 = vmatmul.msk.f32.vlgmr.msra.gmra.mxu0 %vm581_vm5, %v1484_v11  ;;  %v919_v11 = vld [vmem:[#allocation2 + $0x578] sm:$0xff]  ;;  %v921_v13 = vld [vmem:[#allocation2 + $0x588] sm:$0xff] }
 0x254   :  { %695 = vmatpush.msrb.mxu0 %v573_v14  ;;  %1488 = vmatmul.msk.f32.vlgmr.msra.gmra.mxu1 %vm581_vm5, %v576_v12  ;;  %v920_v12 = vld [vmem:[#allocation2 + $0x580] sm:$0xff]  ;;  %v922_v14 = vld [vmem:[#allocation2 + $0x590] sm:$0xff] }
 0x255   :  { %662 = vmatpush.msra.mxu2 %v541_v7  ;;  %v923_v7 = vld [vmem:[#allocation2 + $0x5e8] sm:$0xff] }
 0x256   :  { %696 = vmatpush.msrb.mxu0 %v570_v8  ;;  %v924_v8 = vld [vmem:[#allocation2 + $0x5f0] sm:$0xff] }
 0x257   :  { %663 = vmatpush.msra.mxu2 %v538_v3  ;;  %v927_v3 = vld [vmem:[#allocation2 + $0x658] sm:$0xff] }
 0x258   :  { %697 = vmatpush.msrb.mxu0 %v567_v4  ;;  %v928_v4 = vld [vmem:[#allocation2 + $0x660] sm:$0xff] }
 0x259   :  { %664 = vmatpush.msra.mxu2 %v535_v0  ;;  %v933_v0 = vld [vmem:[#allocation2 + $0x6d8] sm:$0xff] }
 0x25a   :  { %698 = vmatpush.msrb.mxu0 %v564_v1  ;;  %1492 = vmatmul.msk.f32.vlgmr.msra.gmra.mxu2 %vm581_vm5, %v1490_v15  ;;  %v934_v1 = vld [vmem:[#allocation2 + $0x6e0] sm:$0xff]  ;;  %v915_v15 = vld [vmem:[#allocation2 + $0x508] sm:$0xff] }
 0x25b   :  { %1487 = vmatmul.msk.f32.gmra.mxu0 %vm581_vm5, %v1485_v16  ;;  %981 = vmatpush.msrb.mxu3 %v933_v0  ;;  %v916_v16 = vld [vmem:[#allocation2 + $0x510] sm:$0xff]  ;;  %v873_v0 = vld [vmem:[#allocation2 + $0x48] sm:$0xff] }
 0x25c   :  { %1489 = vmatmul.msk.f32.gmra.mxu1 %vm581_vm5, %v577_v17  ;;  %806 = vmatpush.msra.mxu0 %v725_v22  ;;  %v917_v17 = vld [vmem:[#allocation2 + $0x518] sm:$0xff]  ;;  %v914_v22 = vld [vmem:[#allocation2 + $0x4b0] sm:$0xff] }
 0x25d   :  { %982 = vmatpush.msrb.mxu3 %v929_v5 }
 0x25e   :  { %807 = vmatpush.msra.mxu0 %v724_v23  ;;  %v907_v23 = vld [vmem:[#allocation2 + $0x428] sm:$0xff] }
 0x25f   :  { %983 = vmatpush.msrb.mxu3 %v925_v9 }
 0x260   :  { %808 = vmatpush.msra.mxu0 %v723_v26  ;;  %v910_v26 = vld [vmem:[#allocation2 + $0x440] sm:$0xff] }
 0x261   :  { %984 = vmatpush.msrb.mxu3 %v921_v13  ;;  %v1526_v13 = vld [vmem:[%s1953_s6 + $0x1] ss:$0 sm:$0xff] }
 0x262   :  { %1493 = vmatmul.msk.f32.gmra.mxu2 %vm581_vm5, %v1491_v18  ;;  %809 = vmatpush.msra.mxu0 %v722_v27  ;;  %v918_v18 = vld [vmem:[#allocation2 + $0x520] sm:$0xff]  ;;  %v903_v27 = vld [vmem:[#allocation2 + $0x3b8] sm:$0xff] }
 0x263   :  { %1496 = vmatmul.msk.f32.vlgmr.msrb.gmra.mxu0 %vm581_vm5, %v1494_v19  ;;  %985 = vmatpush.msrb.mxu3 %v917_v17  ;;  %v911_v19 = vld [vmem:[#allocation2 + $0x498] sm:$0xff]  ;;  %v1527_v17 = vld [vmem:[%s1953_s6 + $0x2] ss:$0 sm:$0xff] }
 0x264   :  { %810 = vmatpush.msra.mxu0 %v721_v29  ;;  %v904_v29 = vld [vmem:[#allocation2 + $0x3c0] sm:$0xff] }
 0x266   :  { %811 = vmatpush.msra.mxu0 %v720_v31  ;;  %v906_v31 = vld [vmem:[#allocation2 + $0x3d0] sm:$0xff] }
 0x268   :  { %812 = vmatpush.msra.mxu0 %v719_v34  ;;  %v900_v34 = vld [vmem:[#allocation2 + $0x350] sm:$0xff] }
 0x26a   :  { %813 = vmatpush.msra.mxu0 %v718_v36  ;;  %v902_v36 = vld [vmem:[#allocation2 + $0x360] sm:$0xff] }
 0x26b   :  { %1497 = vmatmul.msk.f32.gmra.mxu0 %vm581_vm5, %v1495_v20  ;;  %v912_v20 = vld [vmem:[#allocation2 + $0x4a0] sm:$0xff] }
 0x26c   :  { %814 = vmatpush.msra.mxu0 %v717_v37  ;;  %v895_v37 = vld [vmem:[#allocation2 + $0x2d8] sm:$0xff] }
 0x26e   :  { %815 = vmatpush.msra.mxu0 %v716_v40  ;;  %v898_v40 = vld [vmem:[#allocation2 + $0x2f0] sm:$0xff] }
 0x270   :  { %816 = vmatpush.msra.mxu0 %v715_v44  ;;  %v894_v44 = vld [vmem:[#allocation2 + $0x280] sm:$0xff] }
 0x272   :  { %817 = vmatpush.msra.mxu0 %v714_v48  ;;  %v889_v48 = vld [vmem:[#allocation2 + $0x208] sm:$0xff] }
 0x274   :  { %818 = vmatpush.msra.mxu0 %v713_v50  ;;  %v884_v50 = vld [vmem:[#allocation2 + $0x190] sm:$0xff] }
 0x276   :  { %819 = vmatpush.msra.mxu0 %v712_v51  ;;  %v885_v51 = vld [vmem:[#allocation2 + $0x198] sm:$0xff] }
 0x278   :  { %820 = vmatpush.msra.mxu0 %v711_v52  ;;  %v886_v52 = vld [vmem:[#allocation2 + $0x1a0] sm:$0xff] }
 0x27a   :  { %821 = vmatpush.msra.mxu0 %v710_v33  ;;  %v880_v33 = vld [vmem:[#allocation2 + $0x120] sm:$0xff] }
 0x27c   :  { %1004 = vmatpush.msrb.mxu0 %v934_v1  ;;  %v874_v1 = vld [vmem:[#allocation2 + $0x50] sm:$0xff] }
 0x27e   :  { %1005 = vmatpush.msrb.mxu0 %v930_v6 }
 0x280   :  { %1006 = vmatpush.msrb.mxu0 %v926_v10 }
 0x282   :  { %1007 = vmatpush.msrb.mxu0 %v922_v14 }
 0x284   :  { %1008 = vmatpush.msrb.mxu0 %v918_v18 }
 0x286   :  { %1009 = vmatpush.msrb.mxu0 %v914_v22 }
 0x288   :  { %1010 = vmatpush.msrb.mxu0 %v910_v26 }
 0x28a   :  { %1011 = vmatpush.msrb.mxu0 %v906_v31 }
 0x28c   :  { %1012 = vmatpush.msrb.mxu0 %v902_v36 }
 0x28e   :  { %1013 = vmatpush.msrb.mxu0 %v898_v40 }
 0x290   :  { %1014 = vmatpush.msrb.mxu0 %v894_v44  ;;  %v1143_v44 = vld [vmem:[%s1957_s10 + $0x70] sm:$0xff] }
 0x2d0   :  { %v605_v21 = vpop.f32.mrf.mxu0 }
 0x2d1   :  { %v634_v25 = vpop.f32.mrf.mxu1 }
 0x2d2   :  { %v635_v41 = vadd.f32 %v634_v25, %v605_v21  ;;  %v913_v21 = vld [vmem:[#allocation2 + $0x4a8] sm:$0xff]  ;;  %v909_v25 = vld [vmem:[#allocation2 + $0x438] sm:$0xff] }
 0x2d3   :  { %986 = vmatpush.msrb.mxu3 %v913_v21 }
 0x2d5   :  { %987 = vmatpush.msrb.mxu3 %v909_v25 }
 0x2d8   :  { %v608_v24 = vpop.f32.mrf.mxu0 }
 0x2d9   :  { %v637_v35 = vpop.f32.mrf.mxu1 }
 0x2da   :  { %v638_v38 = vadd.f32 %v637_v35, %v608_v24  ;;  %v908_v24 = vld [vmem:[#allocation2 + $0x430] sm:$0xff]  ;;  %v901_v35 = vld [vmem:[#allocation2 + $0x358] sm:$0xff] }
 0x2dd   :  { %v666_v30 = vpop.f32.mrf.mxu2 }
 0x2de   :  { %v672_v45 = vadd.f32 %v666_v30, %v635_v41  ;;  %v905_v30 = vld [vmem:[#allocation2 + $0x3c8] sm:$0xff] }
 0x2df   :  { %988 = vmatpush.msrb.mxu3 %v905_v30  ;;  %v891_v41 = vld [vmem:[#allocation2 + $0x268] sm:$0xff] }
 0x2e0   :  { %v700_v32 = vpop.f32.mrf.mxu0 }
 0x2e1   :  { %v706_v49 = vadd.f32 %v700_v32, %v672_v45  ;;  %v899_v32 = vld [vmem:[#allocation2 + $0x348] sm:$0xff]  ;;  %989 = vmatpush.msrb.mxu3 %v901_v35  ;;  %v887_v45 = vld [vmem:[#allocation2 + $0x1f8] sm:$0xff] }
 0x2e5   :  { %v669_v39 = vpop.f32.mrf.mxu2 }
 0x2e6   :  { %v673_v42 = vadd.f32 %v669_v39, %v638_v38  ;;  %v896_v38 = vld [vmem:[#allocation2 + $0x2e0] sm:$0xff]  ;;  %v897_v39 = vld [vmem:[#allocation2 + $0x2e8] sm:$0xff] }
 0x2e7   :  { %990 = vmatpush.msrb.mxu3 %v897_v39  ;;  %v1504_v39 = vld [vmem:[%s1951_s4 + $0x8] sm:$0xff] }
 0x2e8   :  { %v703_v43 = vpop.f32.mrf.mxu0 }
 0x2e9   :  { %v707_v47 = vadd.f32 %v703_v43, %v673_v42  ;;  %v892_v42 = vld [vmem:[#allocation2 + $0x270] sm:$0xff]  ;;  %v893_v43 = vld [vmem:[#allocation2 + $0x278] sm:$0xff] }
 0x2ea   :  { %991 = vmatpush.msrb.mxu3 %v893_v43  ;;  %v1144_v43 = vld [vmem:[%s1957_s10 + $0x78] sm:$0xff] }
 0x2eb   :  { %747 = vmatpush.msrb.mxu1 %v707_v47 }
 0x2ec   :  { %992 = vmatpush.msrb.mxu3 %v889_v48  ;;  %v1140_v48 = vld [vmem:[%s1957_s10 + $0x58] sm:$0xff] }
 0x2ed   :  { %748 = vmatpush.msrb.mxu1 %v706_v49 }
 0x2ee   :  { %1498 = vmatmul.msk.f32.vlgmr.msrb.gmra.mxu1 %vm726_vm6, %v708_v28  ;;  %993 = vmatpush.msrb.mxu3 %v885_v51  ;;  %v1136_v51 = vld [vmem:[%s1957_s10 + $0x38] sm:$0xff] }
 0x2ef   :  { %935 = vmatpush.msra.mxu1 %v931_v61  ;;  %v871_v61 = vld [vmem:[#allocation2 + $0x38] sm:$0xff] }
 0x2f1   :  { %936 = vmatpush.msra.mxu1 %v927_v3 }
 0x2f3   :  { %937 = vmatpush.msra.mxu1 %v923_v7 }
 0x2f5   :  { %938 = vmatpush.msra.mxu1 %v919_v11 }
 0x2f6   :  { %1499 = vmatmul.msk.f32.gmra.mxu1 %vm726_vm6, %v709_v53 }
 0x2f7   :  { %939 = vmatpush.msra.mxu1 %v915_v15 }
 0x2f9   :  { %940 = vmatpush.msra.mxu1 %v911_v19 }
 0x2fb   :  { %941 = vmatpush.msra.mxu1 %v907_v23 }
 0x2fd   :  { %942 = vmatpush.msra.mxu1 %v903_v27 }
 0x2ff   :  { %943 = vmatpush.msra.mxu1 %v899_v32 }
 0x301   :  { %944 = vmatpush.msra.mxu1 %v895_v37 }
 0x303   :  { %945 = vmatpush.msra.mxu1 %v891_v41  ;;  %v1507_v41 = vld [vmem:[%s1951_s4 + $0x10] sm:$0xff] }
 0x305   :  { %946 = vmatpush.msra.mxu1 %v887_v45  ;;  %v1142_v45 = vld [vmem:[%s1957_s10 + $0x68] sm:$0xff] }
 0x36b   :  { %v750_v54 = vpop.f32.mrf.mxu1 }
 0x36c   :  { %772 = vmatmul.f32.vlgmr.msra.gmra.mxu3 %v750_v54  ;;  %v881_v54 = vld [vmem:[#allocation2 + $0x128] sm:$0xff] }
 0x36d   :  { %994 = vmatpush.msrb.mxu3 %v881_v54 }
 0x373   :  { %v753_v55 = vpop.f32.mrf.mxu1 }
 0x374   :  { %775 = vmatmul.f32.gmra.mxu3 %v753_v55  ;;  %v882_v55 = vld [vmem:[#allocation2 + $0x130] sm:$0xff] }
 0x3ef   :  { %v773_v56 = vpop.f32.mrf.mxu3 }
 0x3f0   :  { %v1831_v58 = vsub.f32 %v706_v49, %v773_v56  ;;  %v890_v49 = vld [vmem:[#allocation2 + $0x210] sm:$0xff]  ;;  %v875_v56 = vld [vmem:[#allocation2 + $0xa8] sm:$0xff] }
 0x3f1   :  { %1015 = vmatpush.msrb.mxu0 %v890_v49  ;;  %v1139_v49 = vld [vmem:[%s1957_s10 + $0x50] sm:$0xff] }
 0x3f2   :  { %v781_v60 = vmul.f32 %v1831_v58, %v1831_v58 }
 0x3f3   :  { %1016 = vmatpush.msrb.mxu0 %v886_v52  ;;  %v1135_v52 = vld [vmem:[%s1957_s10 + $0x30] sm:$0xff] }
 0x3f5   :  { %1017 = vmatpush.msrb.mxu0 %v882_v55  ;;  %v1133_v55 = vld [vmem:[%s1957_s10 + $0x20] sm:$0xff] }
 0x3f7   :  { %v776_v57 = vpop.f32.mrf.mxu3 }
 0x3f8   :  { %v1833_v46 = vsub.f32 %v707_v47, %v776_v57  ;;  %v888_v47 = vld [vmem:[#allocation2 + $0x200] sm:$0xff]  ;;  %v876_v57 = vld [vmem:[#allocation2 + $0xb0] sm:$0xff] }
 0x3fa   :  { %v782_v59 = vmul.f32 %v1833_v46, %v1833_v46 }
 0x3fc   :  { %797 = vmatpush.msrb.mxu2 %v782_v59  ;;  %v877_v59 = vld [vmem:[#allocation2 + $0xb8] sm:$0xff] }
 0x3fd   :  { %995 = vmatpush.msrb.mxu3 %v877_v59 }
 0x3fe   :  { %798 = vmatpush.msrb.mxu2 %v781_v60  ;;  %v878_v60 = vld [vmem:[#allocation2 + $0xc0] sm:$0xff] }
 0x3ff   :  { %1500 = vmatmul.msk.f32.vlgmr.msrb.gmra.mxu2 %vm726_vm6, %v708_v28  ;;  %v883_v28 = vld [vmem:[#allocation2 + $0x188] sm:$0xff]  ;;  %1018 = vmatpush.msrb.mxu0 %v878_v60 }
 0x400   :  { %958 = vmatpush.msra.mxu2 %v932_v62  ;;  %947 = vmatpush.msra.mxu1 %v883_v28  ;;  %v872_v62 = vld [vmem:[#allocation2 + $0x40] sm:$0xff]  ;;  %v1138_v28 = vld [vmem:[%s1957_s10 + $0x48] sm:$0xff] }
 0x401   :  { %996 = vmatpush.msrb.mxu3 %v873_v0  ;;  %1019 = vmatpush.msrb.mxu0 %v874_v1 }
 0x402   :  { %959 = vmatpush.msra.mxu2 %v928_v4 }
 0x403   :  { %1169 = vmatpush.msra.mxu3 %v1144_v43 }
 0x404   :  { %960 = vmatpush.msra.mxu2 %v924_v8 }
 0x405   :  { %1170 = vmatpush.msra.mxu3 %v1143_v44 }
 0x406   :  { %961 = vmatpush.msra.mxu2 %v920_v12 }
 0x407   :  { %1501 = vmatmul.msk.f32.gmra.mxu2 %vm726_vm6, %v709_v53  ;;  %v879_v53 = vld [vmem:[#allocation2 + $0x118] sm:$0xff]  ;;  %1171 = vmatpush.msra.mxu3 %v1142_v45 }
 0x408   :  { %962 = vmatpush.msra.mxu2 %v916_v16  ;;  %948 = vmatpush.msra.mxu1 %v879_v53 }
 0x40a   :  { %963 = vmatpush.msra.mxu2 %v912_v20  ;;  %949 = vmatpush.msra.mxu1 %v875_v56  ;;  %v1132_v56 = vld [vmem:[%s1957_s10 + $0x18] sm:$0xff] }
 0x40c   :  { %964 = vmatpush.msra.mxu2 %v908_v24  ;;  %950 = vmatpush.msra.mxu1 %v871_v61  ;;  %v1130_v61 = vld [vmem:[%s1957_s10 + $0x8] sm:$0xff] }
 0x40e   :  { %965 = vmatpush.msra.mxu2 %v904_v29 }
 0x410   :  { %966 = vmatpush.msra.mxu2 %v900_v34 }
 0x412   :  { %967 = vmatpush.msra.mxu2 %v896_v38 }
 0x414   :  { %968 = vmatpush.msra.mxu2 %v892_v42  ;;  %v1509_v42 = vld [vmem:[%s1951_s4 + $0x18] sm:$0xff] }
 0x416   :  { %969 = vmatpush.msra.mxu2 %v888_v47  ;;  %v1141_v47 = vld [vmem:[%s1957_s10 + $0x60] sm:$0xff] }
 0x417   :  { %1172 = vmatpush.msra.mxu3 %v1141_v47 }
 0x418   :  { %970 = vmatpush.msra.mxu2 %v884_v50  ;;  %v1137_v50 = vld [vmem:[%s1957_s10 + $0x40] sm:$0xff] }
 0x419   :  { %1173 = vmatpush.msra.mxu3 %v1140_v48 }
 0x41a   :  { %971 = vmatpush.msra.mxu2 %v880_v33  ;;  %v1134_v33 = vld [vmem:[%s1957_s10 + $0x28] sm:$0xff] }
 0x41b   :  { %1174 = vmatpush.msra.mxu3 %v1139_v49 }
 0x41c   :  { %972 = vmatpush.msra.mxu2 %v876_v57  ;;  %v1131_v57 = vld [vmem:[%s1957_s10 + $0x10] sm:$0xff] }
 0x41d   :  { %1175 = vmatpush.msra.mxu3 %v1138_v28 }
 0x41e   :  { %973 = vmatpush.msra.mxu2 %v872_v62 }
 0x41f   :  { %1176 = vmatpush.msra.mxu3 %v1137_v50 }
 0x421   :  { %1177 = vmatpush.msra.mxu3 %v1136_v51 }
 0x423   :  { %1178 = vmatpush.msra.mxu3 %v1135_v52 }
 0x425   :  { %1179 = vmatpush.msra.mxu3 %v1134_v33 }
 0x427   :  { %1180 = vmatpush.msra.mxu3 %v1133_v55 }
 0x429   :  { %1181 = vmatpush.msra.mxu3 %v1132_v56 }
 0x42b   :  { %1182 = vmatpush.msra.mxu3 %v1131_v57 }
 0x42d   :  { %1183 = vmatpush.msra.mxu3 %v1130_v61 }
 0x482   :  { %v800_v63 = vpop.f32.mrf.mxu2 }
 0x483   :  { %822 = vmatmul.f32.vlgmr.msra.gmra.mxu0 %v800_v63 }
 0x48a   :  { %v803_v2 = vpop.f32.mrf.mxu2 }
 0x48b   :  { %825 = vmatmul.f32.gmra.mxu0 %v803_v2 }
 0x500   :  { %v823_v63 = vpop.f32.mrf.mxu0 }
 0x501   :  { %v824_v2 = vadd.f32 1e-05, %v823_v63  ;;  %v1128_v63 = vld [vmem:[%s1956_s9] sm:$0xff] }
 0x503   :  { %1531 = vrsqrt.f32 %v824_v2  ;;  %vm835_vm8 = vweird.f32 %v824_v2 }
 0x508   :  { %v826_v3 = vpop.f32.mrf.mxu0 }
 0x509   :  { %v1532_v4 = vpop.eup %1531  ;;  %v827_v5 = vadd.f32 1e-05, %v826_v3 }
 0x50a   :  { %v830_v6 = vmul.f32 %v1532_v4, %v824_v2  ;;  %vm836_vm7 = vweird.f32 %v1532_v4  ;;  %v1129_v2 = vld [vmem:[%s1957_s10] sm:$0xff] }
 0x50b   :  { %1533 = vrsqrt.f32 %v827_v5  ;;  %vm837_vm9 = vmor %vm835_vm8, %vm836_vm7  ;;  %vm845_vm11 = vweird.f32 %v827_v5  ;;  %1184 = vmatpush.msra.mxu3 %v1129_v2 }
 0x50c   :  { %v831_v7 = vmul.f32 %v1532_v4, %v830_v6 }
 0x50e   :  { %v832_v8 = vmul.f32 0.5, %v831_v7  ;;  %v1302_v7 = vld [vmem:[#allocation2 + $0x6e8] sm:$0xff] }
 0x50f   :  { %1305 = vmatpush.msra.mxu0 %v1302_v7 }
 0x510   :  { %v833_v9 = vsub.f32 1.5, %v832_v8  ;;  %v1303_v8 = vld [vmem:[#allocation2 + $0x6f0] sm:$0xff] }
 0x511   :  { %v1534_v10 = vpop.eup %1533 }
 0x512   :  { %v834_v11 = vmul.f32 %v1532_v4, %v833_v9  ;;  %v840_v12 = vmul.f32 %v1534_v10, %v827_v5  ;;  %vm846_vm10 = vweird.f32 %v1534_v10  ;;  %v1304_v9 = vld [vmem:[#allocation2 + $0x6f8] sm:$0xff] }
 0x513   :  { %vm847_vm12 = vmor %vm845_vm11, %vm846_vm10 }
 0x514   :  { %v838_v14 = vsel %vm837_vm9, %v1532_v4, %v834_v11  ;;  %v841_v15 = vmul.f32 %v1534_v10, %v840_v12  ;;  %v1299_v11 = vld [vmem:[#allocation2 + $0x678] sm:$0xff]  ;;  %v1300_v12 = vld [vmem:[#allocation2 + $0x680] sm:$0xff] }
 0x515   :  { %v849_v16 = vmul.f32 %v838_v14, %v1831_v58  ;;  %1306 = vmatpush.msra.mxu0 %v1299_v11  ;;  %v1296_v14 = vld [vmem:[#allocation2 + $0x608] sm:$0xff] }
 0x516   :  { %v842_v18 = vmul.f32 0.5, %v841_v15  ;;  %v1297_v15 = vld [vmem:[#allocation2 + $0x610] sm:$0xff] }
 0x517   :  { %v856_v19 = vmul.f32 %v1526_v13, %v849_v16  ;;  %v1298_v16 = vld [vmem:[#allocation2 + $0x618] sm:$0xff]  ;;  %1307 = vmatpush.msra.mxu0 %v1296_v14 }
 0x518   :  { %v843_v20 = vsub.f32 1.5, %v842_v18  ;;  %v1294_v18 = vld [vmem:[#allocation2 + $0x5a0] sm:$0xff] }
 0x519   :  { %v863_v21 = vadd.f32 %v1527_v17, %v856_v19  ;;  %v1295_v19 = vld [vmem:[#allocation2 + $0x5a8] sm:$0xff] }
 0x51a   :  { %v844_v22 = vmul.f32 %v1534_v10, %v843_v20  ;;  %v1290_v20 = vld [vmem:[#allocation2 + $0x528] sm:$0xff] }
 0x51b   :  { %vm865_vm13 = vcmp.ge.f32.partialorder %v863_v21, 0.0  ;;  %v867_v23 = vmul.f32 0.2, %v863_v21 }
 0x51c   :  { %v848_v24 = vsel %vm847_vm12, %v1534_v10, %v844_v22  ;;  %v1292_v22 = vld [vmem:[#allocation2 + $0x538] sm:$0xff] }
 0x51d   :  { %v850_v25 = vmul.f32 %v848_v24, %v1833_v46  ;;  %v869_v26 = vsel %vm865_vm13, %v863_v21, %v867_v23  ;;  %v1027_v46 = vld [vmem:[%s1951_s4] sm:$0xff]  ;;  %v1291_v21 = vld [vmem:[#allocation2 + $0x530] sm:$0xff]  ;;  %v1287_v23 = vld [vmem:[#allocation2 + $0x4b8] sm:$0xff] }
 0x51e   :  { %951 = vmatmul.f32.vlgmr.msra.gmra.mxu1 %v869_v26  ;;  %974 = vmatmul.f32.vlgmr.msra.gmra.mxu2 %v869_v26  ;;  %v1288_v24 = vld [vmem:[#allocation2 + $0x4c0] sm:$0xff] }
 0x51f   :  { %997 = vmatmul.f32.vlgmr.msrb.gmra.mxu3 %v869_v26  ;;  %1020 = vmatmul.f32.vlgmr.msrb.gmra.mxu0 %v869_v26  ;;  %v857_v58 = vmul.f32 %v1526_v13, %v850_v25  ;;  %v1301_v13 = vld [vmem:[#allocation2 + $0x688] sm:$0xff] }
 0x520   :  { %1345 = vmatpush.msrb.mxu3 %v1304_v9  ;;  %v1289_v25 = vld [vmem:[#allocation2 + $0x4c8] sm:$0xff]  ;;  %v1515_v9 = vld [vmem:[%s1952_s5 + $0x4] sm:$0xf] }
 0x521   :  { %v864_v27 = vadd.f32 %v1527_v17, %v857_v58  ;;  %v1293_v17 = vld [vmem:[#allocation2 + $0x598] sm:$0xff]  ;;  %v1284_v26 = vld [vmem:[#allocation2 + $0x448] sm:$0xff]  ;;  %v1285_v58 = vld [vmem:[#allocation2 + $0x450] sm:$0xff] }
 0x522   :  { %1346 = vmatpush.msrb.mxu3 %v1301_v13  ;;  %1308 = vmatpush.msra.mxu0 %v1293_v17 }
 0x523   :  { %vm866_vm14 = vcmp.ge.f32.partialorder %v864_v27, 0.0  ;;  %v868_v29 = vmul.f32 0.2, %v864_v27 }
 0x524   :  { %1347 = vmatpush.msrb.mxu3 %v1298_v16  ;;  %1309 = vmatpush.msra.mxu0 %v1290_v20 }
 0x525   :  { %v870_v30 = vsel %vm866_vm14, %v864_v27, %v868_v29  ;;  %v1286_v27 = vld [vmem:[#allocation2 + $0x458] sm:$0xff] }
 0x526   :  { %954 = vmatmul.f32.gmra.mxu1 %v870_v30  ;;  %977 = vmatmul.f32.gmra.mxu2 %v870_v30  ;;  %v1281_v29 = vld [vmem:[#allocation2 + $0x3d8] sm:$0xff] }
 0x527   :  { %1000 = vmatmul.f32.gmra.mxu3 %v870_v30  ;;  %1023 = vmatmul.f32.gmra.mxu0 %v870_v30  ;;  %v1282_v30 = vld [vmem:[#allocation2 + $0x3e0] sm:$0xff] }
 0x528   :  { %1348 = vmatpush.msrb.mxu3 %v1295_v19  ;;  %1310 = vmatpush.msra.mxu0 %v1287_v23 }
 0x52a   :  { %1349 = vmatpush.msrb.mxu3 %v1292_v22  ;;  %1311 = vmatpush.msra.mxu0 %v1284_v26 }
 0x52c   :  { %1350 = vmatpush.msrb.mxu3 %v1289_v25  ;;  %1312 = vmatpush.msra.mxu0 %v1281_v29 }
 0x52e   :  { %1351 = vmatpush.msrb.mxu3 %v1286_v27 }
 0x59b   :  { %v952_v31 = vpop.f32.mrf.mxu1 }
 0x59c   :  { %v1021_v34 = vpop.f32.mrf.mxu0 }
 0x5a1   :  { %v975_v32 = vpop.f32.mrf.mxu2 }
 0x5a2   :  { %v998_v35 = vpop.f32.mrf.mxu3 }
 0x5a3   :  { %v955_v36 = vpop.f32.mrf.mxu1 }
 0x5a4   :  { %1070 = vmatpush.msrb.mxu2 %v955_v36  ;;  %v1024_v40 = vpop.f32.mrf.mxu0  ;;  %v1275_v36 = vld [vmem:[#allocation2 + $0x2f8] sm:$0xff] }
 0x5a6   :  { %1071 = vmatpush.msrb.mxu2 %v952_v31  ;;  %v1283_v31 = vld [vmem:[#allocation2 + $0x3e8] sm:$0xff] }
 0x5a7   :  { %1506 = vmatmul.msk.f32.vlgmr.msrb.gmra.mxu2 %vm726_vm6, %v1027_v46  ;;  %1352 = vmatpush.msrb.mxu3 %v1283_v31  ;;  %v1276_v46 = vld [vmem:[#allocation2 + $0x300] sm:$0xff] }
 0x5a9   :  { %v978_v37 = vpop.f32.mrf.mxu2 }
 0x5aa   :  { %v1001_v38 = vpop.f32.mrf.mxu3  ;;  %1047 = vmatpush.msrb.mxu1 %v978_v37  ;;  %v1277_v37 = vld [vmem:[#allocation2 + $0x308] sm:$0xff] }
 0x5ab   :  { %1095 = vmatpush.msra.mxu2 %v1001_v38  ;;  %v1272_v38 = vld [vmem:[#allocation2 + $0x288] sm:$0xff] }
 0x5ac   :  { %1048 = vmatpush.msrb.mxu1 %v975_v32  ;;  %v1278_v32 = vld [vmem:[#allocation2 + $0x368] sm:$0xff] }
 0x5ad   :  { %1096 = vmatpush.msra.mxu2 %v998_v35  ;;  %1505 = vmatmul.msk.f32.vlgmr.msrb.gmra.mxu1 %vm726_vm6, %v1504_v39  ;;  %v1280_v35 = vld [vmem:[#allocation2 + $0x378] sm:$0xff]  ;;  %v1273_v39 = vld [vmem:[#allocation2 + $0x290] sm:$0xff] }
 0x5ae   :  { %1121 = vmatpush.msra.mxu1 %v1024_v40  ;;  %1313 = vmatpush.msra.mxu0 %v1278_v32  ;;  %v1274_v40 = vld [vmem:[#allocation2 + $0x298] sm:$0xff] }
 0x5af   :  { %1508 = vmatmul.msk.f32.vlgmr.msra.gmra.mxu2 %vm726_vm6, %v1507_v41  ;;  %1353 = vmatpush.msrb.mxu3 %v1280_v35  ;;  %v1269_v41 = vld [vmem:[#allocation2 + $0x218] sm:$0xff] }
 0x5b0   :  { %1122 = vmatpush.msra.mxu1 %v1021_v34  ;;  %v1279_v34 = vld [vmem:[#allocation2 + $0x370] sm:$0xff]  ;;  %1314 = vmatpush.msra.mxu0 %v1275_v36 }
 0x5b1   :  { %1354 = vmatpush.msrb.mxu3 %v1277_v37 }
 0x5b2   :  { %1315 = vmatpush.msra.mxu0 %v1272_v38 }
 0x5b3   :  { %1355 = vmatpush.msrb.mxu3 %v1274_v40 }
 0x5b4   :  { %1316 = vmatpush.msra.mxu0 %v1269_v41 }
 0x5b5   :  { %1510 = vmatmul.msk.f32.vlgmr.msra.gmra.mxu1 %vm726_vm6, %v1509_v42  ;;  %v1270_v42 = vld [vmem:[#allocation2 + $0x220] sm:$0xff] }
 0x62a   :  { %v1073_v53 = vpop.f32.mrf.mxu2  ;;  %v1050_v54 = vpop.f32.mrf.mxu1 }
 0x62b   :  { %v1074_v59 = vadd.f32 %v1073_v53, %v1050_v54  ;;  %v1257_v53 = vld [vmem:[#allocation2 + $0x58] sm:$0xff]  ;;  %v1259_v54 = vld [vmem:[#allocation2 + $0x68] sm:$0xff] }
 0x632   :  { %v1098_v60 = vpop.f32.mrf.mxu2  ;;  %v1124_v0 = vpop.f32.mrf.mxu1 }
 0x633   :  { %v1101_v62 = vadd.f32 %v1098_v60, %v1074_v59 }
 0x635   :  { %v1127_v1 = vadd.f32 %v1124_v0, %v1101_v62 }
 0x637   :  { %1164 = vmatpush.msrb.mxu2 %v1127_v1 }
 0x638   :  { %1511 = vmatmul.msk.f32.vlgmr.msrb.gmra.mxu2 %vm1145_vm15, %v1128_v63 }
 0x639   :  { %1211 = vmatpush.msra.mxu2 %v1144_v43  ;;  %v1271_v43 = vld [vmem:[#allocation2 + $0x228] sm:$0xff] }
 0x63a   :  { %1356 = vmatpush.msrb.mxu3 %v1271_v43 }
 0x63b   :  { %1212 = vmatpush.msra.mxu2 %v1143_v44  ;;  %v1266_v44 = vld [vmem:[#allocation2 + $0x1a8] sm:$0xff] }
 0x63c   :  { %1317 = vmatpush.msra.mxu0 %v1266_v44 }
 0x63d   :  { %1213 = vmatpush.msra.mxu2 %v1142_v45  ;;  %v1267_v45 = vld [vmem:[#allocation2 + $0x1b0] sm:$0xff] }
 0x63f   :  { %1214 = vmatpush.msra.mxu2 %v1141_v47  ;;  %v1268_v47 = vld [vmem:[#allocation2 + $0x1b8] sm:$0xff] }
 0x640   :  { %1357 = vmatpush.msrb.mxu3 %v1268_v47 }
 0x641   :  { %1215 = vmatpush.msra.mxu2 %v1140_v48  ;;  %v1263_v48 = vld [vmem:[#allocation2 + $0x138] sm:$0xff] }
 0x642   :  { %1318 = vmatpush.msra.mxu0 %v1263_v48 }
 0x643   :  { %1216 = vmatpush.msra.mxu2 %v1139_v49  ;;  %v1264_v49 = vld [vmem:[#allocation2 + $0x140] sm:$0xff] }
 0x645   :  { %1217 = vmatpush.msra.mxu2 %v1138_v28  ;;  %v1265_v28 = vld [vmem:[#allocation2 + $0x148] sm:$0xff] }
 0x646   :  { %1358 = vmatpush.msrb.mxu3 %v1265_v28 }
 0x647   :  { %1218 = vmatpush.msra.mxu2 %v1137_v50  ;;  %v1260_v50 = vld [vmem:[#allocation2 + $0xc8] sm:$0xff] }
 0x648   :  { %1319 = vmatpush.msra.mxu0 %v1260_v50 }
 0x649   :  { %1219 = vmatpush.msra.mxu2 %v1136_v51  ;;  %v1261_v51 = vld [vmem:[#allocation2 + $0xd0] sm:$0xff] }
 0x64a   :  { %1320 = vmatpush.msra.mxu0 %v1257_v53 }
 0x64b   :  { %1220 = vmatpush.msra.mxu2 %v1135_v52  ;;  %v1262_v52 = vld [vmem:[#allocation2 + $0xd8] sm:$0xff] }
 0x64c   :  { %1359 = vmatpush.msrb.mxu3 %v1262_v52 }
 0x64d   :  { %1221 = vmatpush.msra.mxu2 %v1134_v33  ;;  %v1258_v33 = vld [vmem:[#allocation2 + $0x60] sm:$0xff] }
 0x64e   :  { %1360 = vmatpush.msrb.mxu3 %v1259_v54 }
 0x64f   :  { %1222 = vmatpush.msra.mxu2 %v1133_v55 }
 0x651   :  { %1223 = vmatpush.msra.mxu2 %v1132_v56 }
 0x653   :  { %1224 = vmatpush.msra.mxu2 %v1131_v57 }
 0x655   :  { %1225 = vmatpush.msra.mxu2 %v1130_v61 }
 0x657   :  { %1226 = vmatpush.msra.mxu2 %v1129_v2 }
 0x6bb   :  { %v1166_v3 = vpop.f32.mrf.mxu2 }
 0x6bc   :  { %1185 = vmatmul.f32.vlgmr.msra.gmra.mxu3 %v1166_v3  ;;  %v1529_v3 = vld [vmem:[%s1953_s6 + $0x4] ss:$0 sm:$0xff] }
 0x73f   :  { %v1186_v4 = vpop.f32.mrf.mxu3 }
 0x740   :  { %v1917_v5 = vsub.f32 %v1127_v1, %v1186_v4  ;;  %v1528_v1 = vld [vmem:[%s1953_s6 + $0x3] ss:$0 sm:$0xff] }
 0x742   :  { %v1190_v6 = vmul.f32 %v1917_v5, %v1917_v5 }
 0x744   :  { %1206 = vmatpush.msrb.mxu1 %v1190_v6 }
 0x745   :  { %1512 = vmatmul.msk.f32.vlgmr.msrb.gmra.mxu1 %vm1145_vm15, %v1128_v63 }
 0x746   :  { %1325 = vmatpush.msra.mxu1 %v1303_v8 }
 0x748   :  { %1326 = vmatpush.msra.mxu1 %v1300_v12  ;;  %v1518_v12 = vld [vmem:[%s1952_s5 + $0x8] sm:$0xf] }
 0x74a   :  { %1327 = vmatpush.msra.mxu1 %v1297_v15 }
 0x74c   :  { %1328 = vmatpush.msra.mxu1 %v1294_v18  ;;  %v1530_v18 = vld [vmem:[%s1953_s6 + $0x5] ss:$0 sm:$0xff] }
 0x74e   :  { %1329 = vmatpush.msra.mxu1 %v1291_v21 }
 0x750   :  { %1330 = vmatpush.msra.mxu1 %v1288_v24 }
 0x752   :  { %1331 = vmatpush.msra.mxu1 %v1285_v58 }
 0x754   :  { %1332 = vmatpush.msra.mxu1 %v1282_v30 }
 0x756   :  { %1333 = vmatpush.msra.mxu1 %v1279_v34 }
 0x758   :  { %1334 = vmatpush.msra.mxu1 %v1276_v46 }
 0x75a   :  { %1335 = vmatpush.msra.mxu1 %v1273_v39 }
 0x75c   :  { %1336 = vmatpush.msra.mxu1 %v1270_v42 }
 0x75e   :  { %1337 = vmatpush.msra.mxu1 %v1267_v45 }
 0x760   :  { %1338 = vmatpush.msra.mxu1 %v1264_v49 }
 0x762   :  { %1339 = vmatpush.msra.mxu1 %v1261_v51 }
 0x764   :  { %1340 = vmatpush.msra.mxu1 %v1258_v33 }
 0x7c2   :  { %v1208_v10 = vpop.f32.mrf.mxu1 }
 0x7c3   :  { %1227 = vmatmul.f32.vlgmr.msra.gmra.mxu2 %v1208_v10 }
 0x846   :  { %v1228_v55 = vpop.f32.mrf.mxu2 }
 0x847   :  { %v1229_v56 = vadd.f32 1e-05, %v1228_v55 }
 0x849   :  { %1535 = vrsqrt.f32 %v1229_v56  ;;  %vm1237_vm1 = vweird.f32 %v1229_v56 }
 0x84f   :  { %v1536_v57 = vpop.eup %1535 }
 0x850   :  { %v1232_v59 = vmul.f32 %v1536_v57, %v1229_v56  ;;  %vm1238_vm0 = vweird.f32 %v1536_v57 }
 0x851   :  { %vm1239_vm2 = vmor %vm1237_vm1, %vm1238_vm0 }
 0x852   :  { %v1233_v60 = vmul.f32 %v1536_v57, %v1232_v59 }
 0x854   :  { %v1234_v61 = vmul.f32 0.5, %v1233_v60 }
 0x856   :  { %v1235_v62 = vsub.f32 1.5, %v1234_v61 }
 0x858   :  { %v1236_v0 = vmul.f32 %v1536_v57, %v1235_v62 }
 0x85a   :  { %v1240_v63 = vsel %vm1239_vm2, %v1536_v57, %v1236_v0 }
 0x85b   :  { %v1241_v2 = vmul.f32 %v1240_v63, %v1917_v5  ;;  %v1365_v5 = vld [vmem:[%s1952_s5] sm:$0xf] }
 0x85d   :  { %v1247_v4 = vmul.f32 %v1528_v1, %v1241_v2 }
 0x85f   :  { %v1253_v6 = vadd.f32 %v1529_v3, %v1247_v4 }
 0x861   :  { %vm1254_vm3 = vcmp.ge.f32.partialorder %v1253_v6, 0.0  ;;  %v1255_v7 = vmul.f32 0.2, %v1253_v6 }
 0x863   :  { %v1256_v8 = vsel %vm1254_vm3, %v1253_v6, %v1255_v7 }
 0x864   :  { %1321 = vmatmul.f32.vlgmr.msra.gmra.mxu0 %v1256_v8  ;;  %1341 = vmatmul.f32.vlgmr.msra.gmra.mxu1 %v1256_v8 }
 0x865   :  { %1361 = vmatmul.f32.vlgmr.msrb.gmra.mxu3 %v1256_v8 }
 0x8e1   :  { %v1322_v10 = vpop.f32.mrf.mxu0  ;;  %v1342_v11 = vpop.f32.mrf.mxu1 }
 0x8e2   :  { %1386 = vmatpush.msrb.mxu2 %v1342_v11  ;;  %1409 = vmatpush.msrb.mxu0 %v1322_v10 }
 0x8e3   :  { %1516 = vmatmul.msk.f32.vlgmr.msrb.gmra.mxu2 %vm1145_vm15, %v1515_v9  ;;  %1517 = vmatmul.msk.f32.vlgmr.msrb.gmra.mxu0 %vm1145_vm15, %v1365_v5 }
 0x8e8   :  { %v1362_v13 = vpop.f32.mrf.mxu3 }
 0x8e9   :  { %1434 = vmatpush.msrb.mxu1 %v1362_v13 }
 0x8ea   :  { %1519 = vmatmul.msk.f32.vlgmr.msrb.gmra.mxu1 %vm1145_vm15, %v1518_v12 }
 0x960   :  { %v1411_v14 = vpop.f32.mrf.mxu0 }
 0x966   :  { %v1388_v15 = vpop.f32.mrf.mxu2 }
 0x967   :  { %v1412_v16 = vadd.f32 %v1411_v14, %v1388_v15  ;;  %v1436_v17 = vpop.f32.mrf.mxu1 }
 0x969   :  { %v1439_v19 = vadd.f32 %v1436_v17, %v1412_v16 }
 0x96b   :  { %v1445_v20 = vadd.f32 %v1530_v18, %v1439_v19 }
 0x96d   :  { %1446 = vst [vmem:[#allocation5] sm:$0xf] %v1445_v20 }
 0x96e   :  { %1457 = dma.vmem_to_hbm [thread:$0]  %s1453_s12, 64, %s1455_s15, [#allocation4]  }
 0x96f   :  { %1587 = dma.done.wait [#allocation4], 64  }
 0x970   :  { %1588 = vsyncadd [#allocation4], 4294967232 }
 0x971   :  { %1462 = vsyncpa [#allocation3], 1 }
 0x972   :  { %1463 = vsyncpa [#allocation4], 1 }

</bundles_post_ra>
